<compile_context>
chip_gen: v6e
topology: v6e:2x2x1
jax: 0.10.0
libtpu: 0.0.40
codegen_flags: <defaults>
</compile_context>

<pallas_src>
import functools

import jax
import jax.numpy as jnp
from jax.experimental import pallas as pl
from jax.experimental.pallas import tpu as pltpu

HIDDEN_DIM = 64
NUM_HIDDEN_LAYERS = 4
INPUT_DIM = 1
OUTPUT_DIM = 9
OUT_PAD = 128  # lane-dense padded output width


# ---------------------------------------------------------------------------
# Generation-aware knobs
# ---------------------------------------------------------------------------
def _device_kind():
    try:
        return jax.devices()[0].device_kind.lower()
    except Exception:
        return ""


def _min_grid_steps():
    # v7x has 2 TensorCores per chip: keep >= 2 parallel grid steps so both
    # cores get work.  v5e/v6e are single-TC, so a grid of 1 is fine there.
    kind = _device_kind()
    return 2 if ("v7" in kind or "7x" in kind) else 1


def _default_act_dtype():
    # v5-generation chips have no bf16 VPU/EUP path -> keep tanh/activations
    # in f32 there; v6e/v7x get ~2x EUP throughput + half the vreg footprint
    # from bf16 activations.
    kind = _device_kind()
    return jnp.float32 if "v5" in kind else jnp.bfloat16


# ---------------------------------------------------------------------------
# Kernel
# ---------------------------------------------------------------------------
def pinn_kernel(t_ref, w_in_ref, b_in_ref, w_h_ref, b_h_ref, w_out_ref,
                b_out_ref, o_ref, *, num_hidden_layers, act_dtype):
    # Matmul operand dtype is whatever the (pre-cast) weights use.
    mm_dtype = w_h_ref.dtype

    # Input layer: a K=1 matmul is just an outer-product broadcast -> keep it
    # on the VPU (no MXU push / result-FIFO pop).  tanh runs on the EUP in
    # act_dtype (bf16 on v6e/v7x, f32 on v5).
    x = jnp.tanh((t_ref[...] * w_in_ref[...] + b_in_ref[...]).astype(act_dtype))

    # Hidden layers (statically unrolled): (tm, H) @ (H, H) + (1, H) -> tanh.
    # Accumulation is always f32; bias add happens in f32 then the activation
    # is carried in act_dtype between layers.
    for l in range(num_hidden_layers):
        h = jnp.dot(x.astype(mm_dtype), w_h_ref[l],
                    preferred_element_type=jnp.float32)
        x = jnp.tanh((h + b_h_ref[pl.ds(l, 1), :]).astype(act_dtype))

    # Output layer, padded to OUT_PAD lanes: (tm, H) @ (H, 128) + (1, 128).
    o_ref[...] = (jnp.dot(x.astype(mm_dtype), w_out_ref[...],
                          preferred_element_type=jnp.float32)
                  + b_out_ref[...]).astype(o_ref.dtype)


# ---------------------------------------------------------------------------
# One-time parameter preprocessing (hoisted off the per-call hot path)
# ---------------------------------------------------------------------------
def prepare_params(params, *, use_bf16=True):
    """Pad the output layer to 128 lanes and pre-cast matmul weights to bf16.

    Run once after init / each optimizer step; the result is what
    `pinn_forward` consumes, so the forward call is a single pallas_call.
    """
    w_in, b_in, w_h, b_h, w_out, b_out = params
    pad_cols = OUT_PAD - w_out.shape[1]
    w_out_p = jnp.pad(w_out, ((0, 0), (0, pad_cols)))
    b_out_p = jnp.pad(b_out, ((0, 0), (0, pad_cols)))
    mm_dtype = jnp.bfloat16 if use_bf16 else jnp.float32
    return (w_in, b_in,
            w_h.astype(mm_dtype), b_h,
            w_out_p.astype(mm_dtype), b_out_p)


# ---------------------------------------------------------------------------
# Forward
# ---------------------------------------------------------------------------
def pinn_forward(t, prepped, *, tm=1024, act_dtype=None):
    """t: (B, INPUT_DIM) float32. prepped: output of prepare_params().
    Returns (B, OUTPUT_DIM) float32."""
    w_in, b_in, w_h, b_h, w_out, b_out = prepped
    B = t.shape[0]
    L, H = w_h.shape[0], w_h.shape[1]

    if act_dtype is None:
        act_dtype = _default_act_dtype()

    # Few, fat tiles: each grid step costs ~0.35us fixed overhead and per-tile
    # VMEM is tiny, so take tm as large as the batch allows while keeping at
    # least `min_grid` parallel steps (2 on v7x so both TensorCores work).
    min_grid = _min_grid_steps()
    tm = min(tm, pl.cdiv(pl.cdiv(B, min_grid), 8) * 8)
    tm = max(8, tm)
    B_pad = pl.cdiv(B, tm) * tm
    if B_pad != B:
        t = jnp.pad(t, ((0, B_pad - B), (0, 0)))
    grid_m = B_pad // tm

    # Advisory cost: transcendental-heavy, cheap kernel (helps XLA overlap it
    # with surrounding ops in a larger training graph).
    flops = 2 * B_pad * (H * INPUT_DIM + L * H * H + H * OUT_PAD)
    transcendentals = B_pad * (L + 1) * H
    bytes_accessed = (
        t.size * t.dtype.itemsize
        + sum(int(a.size) * a.dtype.itemsize
              for a in (w_in, b_in, w_h, b_h, w_out, b_out))
        + B_pad * OUT_PAD * 4)
    cost = pl.CostEstimate(flops=flops, transcendentals=transcendentals,
                           bytes_accessed=bytes_accessed)

    kernel = functools.partial(pinn_kernel, num_hidden_layers=L,
                               act_dtype=act_dtype)

    out = pl.pallas_call(
        kernel,
        out_shape=jax.ShapeDtypeStruct((B_pad, OUT_PAD), jnp.float32),
        grid_spec=pltpu.PrefetchScalarGridSpec(
            num_scalar_prefetch=0,
            grid=(grid_m,),
            in_specs=[
                pl.BlockSpec((tm, INPUT_DIM), lambda i: (i, 0)),   # t tile
                # Grid-invariant weight blocks: index_map always (0,0[,0]) so
                # Pallas fetches them once and skips re-DMA on later steps.
                pl.BlockSpec((INPUT_DIM, H), lambda i: (0, 0)),    # w_in
                pl.BlockSpec((1, H), lambda i: (0, 0)),            # b_in
                pl.BlockSpec((L, H, H), lambda i: (0, 0, 0)),      # w_h (stacked)
                pl.BlockSpec((L, H), lambda i: (0, 0)),            # b_h (stacked)
                pl.BlockSpec((H, OUT_PAD), lambda i: (0, 0)),      # w_out (padded)
                pl.BlockSpec((1, OUT_PAD), lambda i: (0, 0)),      # b_out (padded)
            ],
            out_specs=pl.BlockSpec((tm, OUT_PAD), lambda i: (i, 0)),
        ),
        compiler_params=pltpu.CompilerParams(
            dimension_semantics=("parallel",)),
        cost_estimate=cost,
    )(t, w_in, b_in, w_h, b_h, w_out, b_out)

    return out[:B, :OUTPUT_DIM]


# ---------------------------------------------------------------------------
# Init + reference
# ---------------------------------------------------------------------------
def init_params(key):
    """Deterministic init mimicking nn.Linear's U(-1/sqrt(fan_in), 1/sqrt(fan_in)).

    Weights are stored as (in_features, out_features), i.e. already transposed
    relative to PyTorch's (out, in), so the kernel computes x @ W + b.
    """
    keys = jax.random.split(key, 6)

    def lin(k, fan_in, fan_out):
        kw, kb = jax.random.split(k)
        bound = 1.0 / jnp.sqrt(jnp.float32(fan_in))
        w = jax.random.uniform(kw, (fan_in, fan_out), jnp.float32, -bound, bound)
        b = jax.random.uniform(kb, (1, fan_out), jnp.float32, -bound, bound)
        return w, b

    w_in, b_in = lin(keys[0], INPUT_DIM, HIDDEN_DIM)
    w_hs, b_hs = [], []
    for l in range(NUM_HIDDEN_LAYERS):
        w, b = lin(keys[1 + l], HIDDEN_DIM, HIDDEN_DIM)
        w_hs.append(w)
        b_hs.append(b[0])
    w_h = jnp.stack(w_hs, axis=0)                 # (L, H, H)
    b_h = jnp.stack(b_hs, axis=0)                 # (L, H)
    w_out, b_out = lin(keys[5], HIDDEN_DIM, OUTPUT_DIM)
    return w_in, b_in, w_h, b_h, w_out, b_out


def pinn_reference(t, params):
    """Plain-JAX f32 reference of the same forward pass."""
    w_in, b_in, w_h, b_h, w_out, b_out = params
    x = jnp.tanh(t @ w_in + b_in)
    for l in range(w_h.shape[0]):
        x = jnp.tanh(x @ w_h[l] + b_h[l][None, :])
    return x @ w_out + b_out


if __name__ == "__main__":
    key = jax.random.PRNGKey(0)
    pkey, tkey = jax.random.split(key)

    params = init_params(pkey)
    # deterministic input: small batch of scalar "times"
    B = 256
    t = jax.random.uniform(tkey, (B, INPUT_DIM), jnp.float32, 0.0, 1.0)

    ref = pinn_reference(t, params)

    # Exact f32 path (tight check): f32 matmul operands, f32 activations.
    prep_f32 = prepare_params(params, use_bf16=False)
    out_f32 = jax.block_until_ready(
        pinn_forward(t, prep_f32, act_dtype=jnp.float32))
    assert out_f32.shape == (B, OUTPUT_DIM)
    assert jnp.allclose(out_f32, ref, atol=1e-5, rtol=1e-5)

    # Fast path: bf16 MXU operands, f32 accumulation, bf16 activations on
    # chips with a bf16 VPU/EUP (v6e/v7x), f32 activations on v5 (looser check).
    prep_fast = prepare_params(params, use_bf16=True)
    out_fast = jax.block_until_ready(pinn_forward(t, prep_fast))
    assert out_fast.shape == (B, OUTPUT_DIM)
    assert jnp.allclose(out_fast, ref, atol=5e-2, rtol=5e-2)

    print("KERNEL_OK")
</pallas_src>

<mosaic_0001>
module attributes {stable_mosaic.version = 11 : i64} {
  func.func @pinn_kernel(%arg0: i32, %arg1: memref<256x1xf32, #tpu.memory_space<vmem>>, %arg2: memref<1x64xf32, #tpu.memory_space<vmem>>, %arg3: memref<1x64xf32, #tpu.memory_space<vmem>>, %arg4: memref<4x64x64xf32, #tpu.memory_space<vmem>>, %arg5: memref<4x64xf32, #tpu.memory_space<vmem>>, %arg6: memref<64x128xf32, #tpu.memory_space<vmem>>, %arg7: memref<1x128xf32, #tpu.memory_space<vmem>>, %arg8: memref<256x128xf32, #tpu.memory_space<vmem>>) attributes {dimension_semantics = [#tpu.dimension_semantics<parallel>], iteration_bounds = array<i64: 1>, scalar_prefetch = 0 : i64, scratch_operands = 0 : i64, tpu.core_type = #tpu.core_type<tc>, window_params = [{transform_indices = @transform_0, window_bounds = array<i64: 256, 1>}, {pipeline_mode = #tpu.pipeline_mode<synchronous>, transform_indices = @transform_1, window_bounds = array<i64: 1, 64>}, {pipeline_mode = #tpu.pipeline_mode<synchronous>, transform_indices = @transform_2, window_bounds = array<i64: 1, 64>}, {pipeline_mode = #tpu.pipeline_mode<synchronous>, transform_indices = @transform_3, window_bounds = array<i64: 4, 64, 64>}, {pipeline_mode = #tpu.pipeline_mode<synchronous>, transform_indices = @transform_4, window_bounds = array<i64: 4, 64>}, {pipeline_mode = #tpu.pipeline_mode<synchronous>, transform_indices = @transform_5, window_bounds = array<i64: 64, 128>}, {pipeline_mode = #tpu.pipeline_mode<synchronous>, transform_indices = @transform_6, window_bounds = array<i64: 1, 128>}, {transform_indices = @transform_7, window_bounds = array<i64: 256, 128>}]} {
    %c0 = arith.constant 0 : index
    %c0_0 = arith.constant 0 : index
    %0 = vector.load %arg1[%c0, %c0_0] : memref<256x1xf32, #tpu.memory_space<vmem>>, vector<256x1xf32>
    %c0_1 = arith.constant 0 : index
    %c0_2 = arith.constant 0 : index
    %1 = vector.load %arg2[%c0_1, %c0_2] : memref<1x64xf32, #tpu.memory_space<vmem>>, vector<1x64xf32>
    %2 = vector.broadcast %0 : vector<256x1xf32> to vector<256x64xf32>
    %3 = vector.broadcast %1 : vector<1x64xf32> to vector<256x64xf32>
    %4 = arith.mulf %2, %3 : vector<256x64xf32>
    %c0_3 = arith.constant 0 : index
    %c0_4 = arith.constant 0 : index
    %5 = vector.load %arg3[%c0_3, %c0_4] : memref<1x64xf32, #tpu.memory_space<vmem>>, vector<1x64xf32>
    %6 = vector.broadcast %5 : vector<1x64xf32> to vector<256x64xf32>
    %7 = arith.addf %4, %6 : vector<256x64xf32>
    %8 = math.tanh %7 : vector<256x64xf32>
    %c0_5 = arith.constant 0 : index
    %c0_6 = arith.constant 0 : index
    %c0_7 = arith.constant 0 : index
    %9 = vector.load %arg4[%c0_5, %c0_6, %c0_7] : memref<4x64x64xf32, #tpu.memory_space<vmem>>, vector<1x64x64xf32>
    %10 = vector.shape_cast %9 : vector<1x64x64xf32> to vector<64x64xf32>
    %cst = arith.constant dense<0.000000e+00> : vector<256x64xf32>
    %11 = tpu.matmul %8, %10, %cst {dimension_numbers = #tpu.dot_dimension_numbers<[1], [0], [0], [1], [0, 0, 1, 1], [], []>} : vector<256x64xf32>, vector<64x64xf32>, vector<256x64xf32> -> vector<256x64xf32>
    %c0_8 = arith.constant 0 : index
    %c0_9 = arith.constant 0 : index
    %12 = vector.load %arg5[%c0_8, %c0_9] : memref<4x64xf32, #tpu.memory_space<vmem>>, vector<1x64xf32>
    %13 = vector.broadcast %12 : vector<1x64xf32> to vector<256x64xf32>
    %14 = arith.addf %11, %13 : vector<256x64xf32>
    %15 = math.tanh %14 : vector<256x64xf32>
    %c1 = arith.constant 1 : index
    %c0_10 = arith.constant 0 : index
    %c0_11 = arith.constant 0 : index
    %16 = vector.load %arg4[%c1, %c0_10, %c0_11] : memref<4x64x64xf32, #tpu.memory_space<vmem>>, vector<1x64x64xf32>
    %17 = vector.shape_cast %16 : vector<1x64x64xf32> to vector<64x64xf32>
    %cst_12 = arith.constant dense<0.000000e+00> : vector<256x64xf32>
    %18 = tpu.matmul %15, %17, %cst_12 {dimension_numbers = #tpu.dot_dimension_numbers<[1], [0], [0], [1], [0, 0, 1, 1], [], []>} : vector<256x64xf32>, vector<64x64xf32>, vector<256x64xf32> -> vector<256x64xf32>
    %c1_13 = arith.constant 1 : index
    %c0_14 = arith.constant 0 : index
    %19 = vector.load %arg5[%c1_13, %c0_14] : memref<4x64xf32, #tpu.memory_space<vmem>>, vector<1x64xf32>
    %20 = vector.broadcast %19 : vector<1x64xf32> to vector<256x64xf32>
    %21 = arith.addf %18, %20 : vector<256x64xf32>
    %22 = math.tanh %21 : vector<256x64xf32>
    %c2 = arith.constant 2 : index
    %c0_15 = arith.constant 0 : index
    %c0_16 = arith.constant 0 : index
    %23 = vector.load %arg4[%c2, %c0_15, %c0_16] : memref<4x64x64xf32, #tpu.memory_space<vmem>>, vector<1x64x64xf32>
    %24 = vector.shape_cast %23 : vector<1x64x64xf32> to vector<64x64xf32>
    %cst_17 = arith.constant dense<0.000000e+00> : vector<256x64xf32>
    %25 = tpu.matmul %22, %24, %cst_17 {dimension_numbers = #tpu.dot_dimension_numbers<[1], [0], [0], [1], [0, 0, 1, 1], [], []>} : vector<256x64xf32>, vector<64x64xf32>, vector<256x64xf32> -> vector<256x64xf32>
    %c2_18 = arith.constant 2 : index
    %c0_19 = arith.constant 0 : index
    %26 = vector.load %arg5[%c2_18, %c0_19] : memref<4x64xf32, #tpu.memory_space<vmem>>, vector<1x64xf32>
    %27 = vector.broadcast %26 : vector<1x64xf32> to vector<256x64xf32>
    %28 = arith.addf %25, %27 : vector<256x64xf32>
    %29 = math.tanh %28 : vector<256x64xf32>
    %c3 = arith.constant 3 : index
    %c0_20 = arith.constant 0 : index
    %c0_21 = arith.constant 0 : index
    %30 = vector.load %arg4[%c3, %c0_20, %c0_21] : memref<4x64x64xf32, #tpu.memory_space<vmem>>, vector<1x64x64xf32>
    %31 = vector.shape_cast %30 : vector<1x64x64xf32> to vector<64x64xf32>
    %cst_22 = arith.constant dense<0.000000e+00> : vector<256x64xf32>
    %32 = tpu.matmul %29, %31, %cst_22 {dimension_numbers = #tpu.dot_dimension_numbers<[1], [0], [0], [1], [0, 0, 1, 1], [], []>} : vector<256x64xf32>, vector<64x64xf32>, vector<256x64xf32> -> vector<256x64xf32>
    %c3_23 = arith.constant 3 : index
    %c0_24 = arith.constant 0 : index
    %33 = vector.load %arg5[%c3_23, %c0_24] : memref<4x64xf32, #tpu.memory_space<vmem>>, vector<1x64xf32>
    %34 = vector.broadcast %33 : vector<1x64xf32> to vector<256x64xf32>
    %35 = arith.addf %32, %34 : vector<256x64xf32>
    %36 = math.tanh %35 : vector<256x64xf32>
    %c0_25 = arith.constant 0 : index
    %c0_26 = arith.constant 0 : index
    %37 = vector.load %arg6[%c0_25, %c0_26] : memref<64x128xf32, #tpu.memory_space<vmem>>, vector<64x128xf32>
    %cst_27 = arith.constant dense<0.000000e+00> : vector<256x128xf32>
    %38 = tpu.matmul %36, %37, %cst_27 {dimension_numbers = #tpu.dot_dimension_numbers<[1], [0], [0], [1], [0, 0, 1, 1], [], []>} : vector<256x64xf32>, vector<64x128xf32>, vector<256x128xf32> -> vector<256x128xf32>
    %c0_28 = arith.constant 0 : index
    %c0_29 = arith.constant 0 : index
    %39 = vector.load %arg7[%c0_28, %c0_29] : memref<1x128xf32, #tpu.memory_space<vmem>>, vector<1x128xf32>
    %40 = vector.broadcast %39 : vector<1x128xf32> to vector<256x128xf32>
    %41 = arith.addf %38, %40 : vector<256x128xf32>
    %c0_30 = arith.constant 0 : index
    %c0_31 = arith.constant 0 : index
    %42 = vector.load %arg8[%c0_30, %c0_31] : memref<256x128xf32, #tpu.memory_space<vmem>>, vector<256x128xf32>
    tpu.vector_store %arg8[%c0_30, %c0_31], %41 {strides = array<i32>} : memref<256x128xf32, #tpu.memory_space<vmem>>, vector<256x128xf32>,
    return
  }
  func.func @transform_0(%arg0: i32) -> (i32, i32) {
    %c0_i32 = arith.constant 0 : i32
    %c0_i32_0 = arith.constant 0 : i32
    return %arg0, %c0_i32 : i32, i32
  }
  func.func @transform_1(%arg0: i32) -> (i32, i32) {
    %c0_i32 = arith.constant 0 : i32
    %c0_i32_0 = arith.constant 0 : i32
    %c0_i32_1 = arith.constant 0 : i32
    return %c0_i32, %c0_i32_0 : i32, i32
  }
  func.func @transform_2(%arg0: i32) -> (i32, i32) {
    %c0_i32 = arith.constant 0 : i32
    %c0_i32_0 = arith.constant 0 : i32
    %c0_i32_1 = arith.constant 0 : i32
    return %c0_i32, %c0_i32_0 : i32, i32
  }
  func.func @transform_3(%arg0: i32) -> (i32, i32, i32) {
    %c0_i32 = arith.constant 0 : i32
    %c0_i32_0 = arith.constant 0 : i32
    %c0_i32_1 = arith.constant 0 : i32
    %c0_i32_2 = arith.constant 0 : i32
    return %c0_i32, %c0_i32_0, %c0_i32_1 : i32, i32, i32
  }
  func.func @transform_4(%arg0: i32) -> (i32, i32) {
    %c0_i32 = arith.constant 0 : i32
    %c0_i32_0 = arith.constant 0 : i32
    %c0_i32_1 = arith.constant 0 : i32
    return %c0_i32, %c0_i32_0 : i32, i32
  }
  func.func @transform_5(%arg0: i32) -> (i32, i32) {
    %c0_i32 = arith.constant 0 : i32
    %c0_i32_0 = arith.constant 0 : i32
    %c0_i32_1 = arith.constant 0 : i32
    return %c0_i32, %c0_i32_0 : i32, i32
  }
  func.func @transform_6(%arg0: i32) -> (i32, i32) {
    %c0_i32 = arith.constant 0 : i32
    %c0_i32_0 = arith.constant 0 : i32
    %c0_i32_1 = arith.constant 0 : i32
    return %c0_i32, %c0_i32_0 : i32, i32
  }
  func.func @transform_7(%arg0: i32) -> (i32, i32) {
    %c0_i32 = arith.constant 0 : i32
    %c0_i32_0 = arith.constant 0 : i32
    return %arg0, %c0_i32 : i32, i32
  }
}

</mosaic_0001>

<bundles_post_ra>
// kernel: tpu_custom_call.1
= control target key start
LH: loop header
LB: loop body
LE: loop exit
PB: predicated region body
PF: predicated region fallthrough
CT: control target
= control target key end

     0   :  { %12 = vsyncpa [#allocation3], 0  ;;  %s3966_s0 = inlined_call_operand.vmem [shape: f32[256,1], index: 0, kind: input, shape index: {}]   ;;  %s3967_s1 = inlined_call_operand.vmem [shape: f32[1,64], index: 1, kind: input, shape index: {}]   ;;  %s3968_s2 = inlined_call_operand.vmem [shape: f32[1,64], index: 2, kind: input, shape index: {}]   ;;  %s3969_s3 = inlined_call_operand.vmem [shape: f32[4,64,64], index: 3, kind: input, shape index: {}]   ;;  %s3970_s4 = inlined_call_operand.vmem [shape: f32[4,64], index: 4, kind: input, shape index: {}]   ;;  %s3971_s5 = inlined_call_operand.hbm [shape: f32[64,128], index: 5, kind: input, shape index: {}]   ;;  %s3972_s6 = inlined_call_operand.vmem [shape: f32[1,128], index: 6, kind: input, shape index: {}]   ;;  %s3973_s7 = inlined_call_operand.hbm [shape: f32[256,128], index: 7, kind: output, shape index: {}]  }
   0x1   :  { %13 = vsyncpa [#allocation4], 0  ;;  %s3294_s24 = smov [#allocation2]  }
   0x2   :  { %s29_s25 = sshll.u32 %s3294_s24, 4  ;;  %s30_s25 = int_to_ptr.vmem [resolvable:$true] %s29_s25 }
   0x3   :  { %s3258_s26 = scalar_lea.vmem %s30_s25, 1024  ;;  %p3263_p1 = scmp.lt.s32.totalorder %s30_s25, %s30_s25 }
   0x4   :  { %p3259_p0 = scmp.ne.s32.totalorder %s30_s25, %s3258_s26  ;;  %p3264_p2 = scmp.lt.s32.totalorder %s3258_s26, %s3258_s26 }
   0x6   :  { %p3265_p3 = por %p3264_p2, %p3263_p1 }
   0x8   :  { %p3266_p4 = pnand %p3265_p3, %p3259_p0 }
   0xa   :  { %3269 = shalt.err (!%p3266_p4)
}
   0xb   :  { %s3295_s27 = smov 128   ;;  %s3296_s28 = smov 8  }
   0xc   :  { %35 = dma.hbm_to_vmem [thread:$0]  %s3971_s5, 1024, %s30_s25, [#allocation3], %s3295_s27, %s3295_s27, %s3296_s28  }
   0xd   :  { %3290 = dma.done.wait [#allocation3], 1024  }
   0xe   :  { %3291 = vsyncadd [#allocation3], 4294966272  ;;  %v3297_v0 = vmov 0   ;;  %v43_v1 = vld [vmem:[%s3966_s0 + $0x10] sm:$0xff]  ;;  %v41_v2 = vld [vmem:[%s3966_s0] sm:$0xff]  ;;  %vm356_vm0 = vcmask 523264  }
   0xf   :  { %2929 = vset.pattern.permute.xlu1 %v3297_v0  ;;  %2928 = vset.pattern.permute.xlu0 %v3297_v0  ;;  %v44_v3 = vld [vmem:[%s3966_s0 + $0x18] sm:$0xff]  ;;  %v42_v4 = vld [vmem:[%s3966_s0 + $0x8] sm:$0xff]  ;;  %v45_v6 = vld [vmem:[%s3966_s0 + $0x20] sm:$0xff] }
  0x10   :  { %86 = vperm.xlu1 %2929, %v43_v1   ;;  %76 = vperm.xlu0 %2928, %v41_v2   ;;  %v46_v5 = vld [vmem:[%s3966_s0 + $0x28] sm:$0xff]  ;;  %v48_v7 = vld [vmem:[%s3966_s0 + $0x38] sm:$0xff]  ;;  %v47_v8 = vld [vmem:[%s3966_s0 + $0x30] sm:$0xff] }
  0x11   :  { %v350_v9 = vld [vmem:[%s3969_s3 + $0x38] sm:$0xff]  ;;  %v349_v10 = vld [vmem:[%s3969_s3 + $0x30] sm:$0xff]  ;;  %v50_v11 = vld [vmem:[%s3966_s0 + $0x48] sm:$0xff] }
  0x12   :  { %2587 = vmatprep.subr.mxu0 %v350_v9  ;;  %2907 = vmatprep.subr.mxu1 %v350_v9  ;;  %v49_v12 = vld [vmem:[%s3966_s0 + $0x40] sm:$0xff]  ;;  %v348_v13 = vld [vmem:[%s3969_s3 + $0x28] sm:$0xff]  ;;  %v52_v15 = vld [vmem:[%s3966_s0 + $0x58] sm:$0xff] }
  0x13   :  { %2588 = vmatpush3.msra.mxu0 %v350_v9  ;;  %2915 = vmatpush3.msra.mxu1 %v350_v9  ;;  %v347_v14 = vld [vmem:[%s3969_s3 + $0x20] sm:$0xff]  ;;  %v51_v16 = vld [vmem:[%s3966_s0 + $0x50] sm:$0xff]  ;;  %v346_v17 = vld [vmem:[%s3969_s3 + $0x18] sm:$0xff] }
  0x14   :  { %91 = vperm.xlu1 %2929, %v44_v3   ;;  %81 = vperm.xlu0 %2928, %v42_v4   ;;  %v54_v18 = vld [vmem:[%s3966_s0 + $0x68] sm:$0xff]  ;;  %v53_v19 = vld [vmem:[%s3966_s0 + $0x60] sm:$0xff]  ;;  %v345_v20 = vld [vmem:[%s3969_s3 + $0x10] sm:$0xff] }
  0x15   :  { %2589 = vmatprep.subr.mxu0 %v349_v10  ;;  %2908 = vmatprep.subr.mxu1 %v349_v10  ;;  %v344_v21 = vld [vmem:[%s3969_s3 + $0x8] sm:$0xff]  ;;  %v56_v22 = vld [vmem:[%s3966_s0 + $0x78] sm:$0xff]  ;;  %v55_v23 = vld [vmem:[%s3966_s0 + $0x70] sm:$0xff] }
  0x16   :  { %2590 = vmatpush3.msra.mxu0 %v349_v10  ;;  %2916 = vmatpush3.msra.mxu1 %v349_v10  ;;  %v343_v24 = vld [vmem:[%s3969_s3] sm:$0xff]  ;;  %v58_v25 = vld [vmem:[%s3966_s0 + $0x88] sm:$0xff]  ;;  %v60_v27 = vld [vmem:[%s3966_s0 + $0x98] sm:$0xff] }
  0x17   :  { %2591 = vmatprep.subr.mxu0 %v348_v13  ;;  %2909 = vmatprep.subr.mxu1 %v348_v13  ;;  %v57_v26 = vld [vmem:[%s3966_s0 + $0x80] sm:$0xff]  ;;  %v59_v28 = vld [vmem:[%s3966_s0 + $0x90] sm:$0xff]  ;;  %v62_v29 = vld [vmem:[%s3966_s0 + $0xa8] sm:$0xff] }
  0x18   :  { %101 = vperm.xlu1 %2929, %v46_v5   ;;  %96 = vperm.xlu0 %2928, %v45_v6   ;;  %v61_v30 = vld [vmem:[%s3966_s0 + $0xa0] sm:$0xff]  ;;  %v64_v31 = vld [vmem:[%s3966_s0 + $0xb8] sm:$0xff]  ;;  %v63_v32 = vld [vmem:[%s3966_s0 + $0xb0] sm:$0xff] }
  0x19   :  { %2592 = vmatpush3.msra.mxu0 %v348_v13  ;;  %2917 = vmatpush3.msra.mxu1 %v348_v13  ;;  %v66_v33 = vld [vmem:[%s3966_s0 + $0xc8] sm:$0xff]  ;;  %v65_v34 = vld [vmem:[%s3966_s0 + $0xc0] sm:$0xff]  ;;  %v68_v35 = vld [vmem:[%s3966_s0 + $0xd8] sm:$0xff] }
  0x1a   :  { %2593 = vmatprep.subr.mxu0 %v347_v14  ;;  %2910 = vmatprep.subr.mxu1 %v347_v14  ;;  %v67_v36 = vld [vmem:[%s3966_s0 + $0xd0] sm:$0xff]  ;;  %v70_v37 = vld [vmem:[%s3966_s0 + $0xe8] sm:$0xff]  ;;  %v69_v38 = vld [vmem:[%s3966_s0 + $0xe0] sm:$0xff] }
  0x1b   :  { %2594 = vmatpush3.msra.mxu0 %v347_v14  ;;  %2918 = vmatpush3.msra.mxu1 %v347_v14  ;;  %v72_v39 = vld [vmem:[%s3966_s0 + $0xf8] sm:$0xff]  ;;  %v71_v40 = vld [vmem:[%s3966_s0 + $0xf0] sm:$0xff]  ;;  %v3474_v42 = vld [vmem:[%s3967_s1] ss:$0 sm:$0xff] }
  0x1c   :  { %111 = vperm.xlu1 %2929, %v48_v7   ;;  %106 = vperm.xlu0 %2928, %v47_v8   ;;  %v3468_v41 = vld [vmem:[%s3969_s3 + $0x78] sm:$0xff]  ;;  %v3479_v43 = vld [vmem:[%s3968_s2] ss:$0 sm:$0xff] }
  0x1d   :  { %2595 = vmatprep.subr.mxu0 %v346_v17  ;;  %2911 = vmatprep.subr.mxu1 %v346_v17 }
  0x1e   :  { %2596 = vmatpush3.msra.mxu0 %v346_v17  ;;  %2919 = vmatpush3.msra.mxu1 %v346_v17 }
  0x1f   :  { %2597 = vmatprep.subr.mxu0 %v345_v20  ;;  %2912 = vmatprep.subr.mxu1 %v345_v20 }
  0x20   :  { %121 = vperm.xlu1 %2929, %v50_v11   ;;  %116 = vperm.xlu0 %2928, %v49_v12  }
  0x21   :  { %2598 = vmatpush3.msra.mxu0 %v345_v20  ;;  %2920 = vmatpush3.msra.mxu1 %v345_v20 }
  0x22   :  { %2599 = vmatprep.subr.mxu0 %v344_v21  ;;  %2913 = vmatprep.subr.mxu1 %v344_v21 }
  0x23   :  { %2600 = vmatpush3.msra.mxu0 %v344_v21  ;;  %2921 = vmatpush3.msra.mxu1 %v344_v21 }
  0x24   :  { %131 = vperm.xlu1 %2929, %v52_v15   ;;  %126 = vperm.xlu0 %2928, %v51_v16  }
  0x25   :  { %2601 = vmatprep.subr.mxu0 %v343_v24  ;;  %2914 = vmatprep.subr.mxu1 %v343_v24 }
  0x26   :  { %2602 = vmatpush3.msra.mxu0 %v343_v24  ;;  %2922 = vmatpush3.msra.mxu1 %v343_v24 }
  0x27   :  { %2651 = vmatprep.subr.mxu1 %v3468_v41 }
  0x28   :  { %141 = vperm.xlu1 %2929, %v54_v18   ;;  %136 = vperm.xlu0 %2928, %v53_v19  }
  0x2c   :  { %151 = vperm.xlu1 %2929, %v56_v22   ;;  %146 = vperm.xlu0 %2928, %v55_v23  }
  0x30   :  { %161 = vperm.xlu1 %2929, %v58_v25   ;;  %156 = vperm.xlu0 %2928, %v57_v26  }
  0x34   :  { %171 = vperm.xlu1 %2929, %v60_v27   ;;  %166 = vperm.xlu0 %2928, %v59_v28  }
  0x38   :  { %181 = vperm.xlu1 %2929, %v62_v29   ;;  %176 = vperm.xlu0 %2928, %v61_v30  }
  0x3c   :  { %191 = vperm.xlu1 %2929, %v64_v31   ;;  %186 = vperm.xlu0 %2928, %v63_v32  }
  0x40   :  { %201 = vperm.xlu1 %2929, %v66_v33   ;;  %196 = vperm.xlu0 %2928, %v65_v34  }
  0x44   :  { %211 = vperm.xlu1 %2929, %v68_v35   ;;  %206 = vperm.xlu0 %2928, %v67_v36  }
  0x48   :  { %221 = vperm.xlu1 %2929, %v70_v37   ;;  %216 = vperm.xlu0 %2928, %v69_v38  }
  0x4c   :  { %231 = vperm.xlu1 %2929, %v72_v39   ;;  %226 = vperm.xlu0 %2928, %v71_v40  }
  0x8b   :  { %v87_v44 = vpop.permute.xlu1 %86  ;;  %v77_v45 = vpop.permute.xlu0 %76 }
  0x8c   :  { %v242_v46 = vmul.f32 %v3474_v42, %v87_v44  ;;  %v240_v47 = vmul.f32 %v3474_v42, %v77_v45 }
  0x8e   :  { %v279_v48 = vadd.f32 %v3479_v43, %v240_v47  ;;  %v281_v51 = vadd.f32 %v3479_v43, %v242_v46 }
  0x8f   :  { %v92_v49 = vpop.permute.xlu1 %91  ;;  %v82_v50 = vpop.permute.xlu0 %81 }
  0x90   :  { %v243_v52 = vmul.f32 %v3474_v42, %v92_v49  ;;  %v241_v53 = vmul.f32 %v3474_v42, %v82_v50  ;;  %2930 = vtanh.f32 %v279_v48 }
  0x91   :  { %2932 = vtanh.f32 %v281_v51 }
  0x92   :  { %v280_v54 = vadd.f32 %v3479_v43, %v241_v53  ;;  %v282_v57 = vadd.f32 %v3479_v43, %v243_v52 }
  0x93   :  { %v102_v55 = vpop.permute.xlu1 %101  ;;  %v97_v56 = vpop.permute.xlu0 %96 }
  0x94   :  { %v245_v58 = vmul.f32 %v3474_v42, %v102_v55  ;;  %v244_v59 = vmul.f32 %v3474_v42, %v97_v56  ;;  %2934 = vtanh.f32 %v280_v54 }
  0x95   :  { %2936 = vtanh.f32 %v282_v57 }
  0x96   :  { %v283_v60 = vadd.f32 %v3479_v43, %v244_v59  ;;  %v284_v63 = vadd.f32 %v3479_v43, %v245_v58 }
  0x97   :  { %v112_v61 = vpop.permute.xlu1 %111  ;;  %v107_v62 = vpop.permute.xlu0 %106 }
  0x98   :  { %v247_v0 = vmul.f32 %v3474_v42, %v112_v61  ;;  %v246_v1 = vmul.f32 %v3474_v42, %v107_v62  ;;  %2938 = vtanh.f32 %v283_v60 }
  0x99   :  { %2940 = vtanh.f32 %v284_v63 }
  0x9a   :  { %v285_v2 = vadd.f32 %v3479_v43, %v246_v1  ;;  %v286_v5 = vadd.f32 %v3479_v43, %v247_v0 }
  0x9b   :  { %v122_v3 = vpop.permute.xlu1 %121  ;;  %v117_v4 = vpop.permute.xlu0 %116 }
  0x9c   :  { %v249_v6 = vmul.f32 %v3474_v42, %v122_v3  ;;  %v248_v7 = vmul.f32 %v3474_v42, %v117_v4  ;;  %2942 = vtanh.f32 %v285_v2 }
  0x9d   :  { %v2931_v8 = vpop.eup %2930  ;;  %2944 = vtanh.f32 %v286_v5 }
  0x9e   :  { %v287_v9 = vadd.f32 %v3479_v43, %v248_v7  ;;  %2603 = vmatprep.mubr.msk.f32.mxu0 %vm356_vm0, %v2931_v8  ;;  %v288_v12 = vadd.f32 %v3479_v43, %v249_v6  ;;  %v2933_v15 = vpop.eup %2932 }
  0x9f   :  { %v132_v10 = vpop.permute.xlu1 %131  ;;  %v127_v11 = vpop.permute.xlu0 %126 }
  0xa0   :  { %v251_v13 = vmul.f32 %v3474_v42, %v132_v10  ;;  %v250_v14 = vmul.f32 %v3474_v42, %v127_v11  ;;  %2946 = vtanh.f32 %v287_v9 }
  0xa1   :  { %v2935_v16 = vpop.eup %2934  ;;  %2948 = vtanh.f32 %v288_v12 }
  0xa2   :  { %v289_v17 = vadd.f32 %v3479_v43, %v250_v14  ;;  %2604 = vmatmul.mubr.msk.f32.vlgmr.msra.gmra.mxu0 %vm356_vm0, %v2935_v16  ;;  %v290_v20 = vadd.f32 %v3479_v43, %v251_v13  ;;  %v2937_v23 = vpop.eup %2936 }
  0xa3   :  { %v142_v18 = vpop.permute.xlu1 %141  ;;  %v137_v19 = vpop.permute.xlu0 %136  ;;  %2606 = vmatprep.mubr.msk.f32.mxu0 %vm356_vm0, %v2933_v15 }
  0xa4   :  { %v253_v21 = vmul.f32 %v3474_v42, %v142_v18  ;;  %v252_v22 = vmul.f32 %v3474_v42, %v137_v19  ;;  %2950 = vtanh.f32 %v289_v17  ;;  %v2237_v17 = vld [vmem:[%s3969_s3 + $0x70] sm:$0xff] }
  0xa5   :  { %v2939_v24 = vpop.eup %2938  ;;  %2952 = vtanh.f32 %v290_v20 }
  0xa6   :  { %v291_v25 = vadd.f32 %v3479_v43, %v252_v22  ;;  %2607 = vmatmul.mubr.msk.f32.gmra.mxu0 %vm356_vm0, %v2937_v23  ;;  %v292_v28 = vadd.f32 %v3479_v43, %v253_v21  ;;  %v2941_v31 = vpop.eup %2940  ;;  %v2236_v21 = vld [vmem:[%s3969_s3 + $0x68] sm:$0xff] }
  0xa7   :  { %v152_v26 = vpop.permute.xlu1 %151  ;;  %v147_v27 = vpop.permute.xlu0 %146  ;;  %2609 = vmatprep.mubr.msk.f32.mxu0 %vm356_vm0, %v2939_v24 }
  0xa8   :  { %v255_v29 = vmul.f32 %v3474_v42, %v152_v26  ;;  %v254_v30 = vmul.f32 %v3474_v42, %v147_v27  ;;  %2954 = vtanh.f32 %v291_v25  ;;  %v2235_v27 = vld [vmem:[%s3969_s3 + $0x60] sm:$0xff] }
  0xa9   :  { %v2943_v32 = vpop.eup %2942  ;;  %2956 = vtanh.f32 %v292_v28 }
  0xaa   :  { %v293_v33 = vadd.f32 %v3479_v43, %v254_v30  ;;  %v294_v34 = vadd.f32 %v3479_v43, %v255_v29  ;;  %2610 = vmatmul.mubr.msk.f32.gmra.mxu0 %vm356_vm0, %v2941_v31  ;;  %v2945_v39 = vpop.eup %2944 }
  0xab   :  { %v162_v35 = vpop.permute.xlu1 %161  ;;  %v157_v36 = vpop.permute.xlu0 %156  ;;  %2612 = vmatprep.mubr.msk.f32.mxu0 %vm356_vm0, %v2943_v32 }
  0xac   :  { %v257_v37 = vmul.f32 %v3474_v42, %v162_v35  ;;  %v256_v38 = vmul.f32 %v3474_v42, %v157_v36  ;;  %2958 = vtanh.f32 %v293_v33 }
  0xad   :  { %v2947_v40 = vpop.eup %2946  ;;  %2960 = vtanh.f32 %v294_v34 }
  0xae   :  { %v296_v44 = vadd.f32 %v3479_v43, %v257_v37  ;;  %v295_v45 = vadd.f32 %v3479_v43, %v256_v38  ;;  %2613 = vmatmul.mubr.msk.f32.gmra.mxu0 %vm356_vm0, %v2945_v39  ;;  %v2949_v50 = vpop.eup %2948 }
  0xaf   :  { %v172_v46 = vpop.permute.xlu1 %171  ;;  %v167_v47 = vpop.permute.xlu0 %166  ;;  %2615 = vmatprep.mubr.msk.f32.mxu0 %vm356_vm0, %v2947_v40 }
  0xb0   :  { %2962 = vtanh.f32 %v296_v44  ;;  %v259_v48 = vmul.f32 %v3474_v42, %v172_v46  ;;  %v258_v49 = vmul.f32 %v3474_v42, %v167_v47 }
  0xb1   :  { %2964 = vtanh.f32 %v295_v45  ;;  %v2951_v51 = vpop.eup %2950 }
  0xb2   :  { %v298_v52 = vadd.f32 %v3479_v43, %v259_v48  ;;  %v297_v53 = vadd.f32 %v3479_v43, %v258_v49  ;;  %2616 = vmatmul.mubr.msk.f32.gmra.mxu0 %vm356_vm0, %v2949_v50  ;;  %v2953_v58 = vpop.eup %2952  ;;  %v2234_v50 = vld [vmem:[%s3969_s3 + $0x58] sm:$0xff] }
  0xb3   :  { %v182_v54 = vpop.permute.xlu1 %181  ;;  %v177_v55 = vpop.permute.xlu0 %176  ;;  %2618 = vmatprep.mubr.msk.f32.mxu0 %vm356_vm0, %v2951_v51  ;;  %v2233_v51 = vld [vmem:[%s3969_s3 + $0x50] sm:$0xff] }
  0xb4   :  { %2966 = vtanh.f32 %v298_v52  ;;  %v261_v56 = vmul.f32 %v3474_v42, %v182_v54  ;;  %v260_v57 = vmul.f32 %v3474_v42, %v177_v55  ;;  %v2232_v52 = vld [vmem:[%s3969_s3 + $0x48] sm:$0xff]  ;;  %v2279_v54 = vld [vmem:[%s3969_s3 + $0xb8] sm:$0xff]  ;;  %v2278_v55 = vld [vmem:[%s3969_s3 + $0xb0] sm:$0xff] }
  0xb5   :  { %2968 = vtanh.f32 %v297_v53  ;;  %v2955_v59 = vpop.eup %2954  ;;  %v2231_v53 = vld [vmem:[%s3969_s3 + $0x40] sm:$0xff]  ;;  %2715 = vmatprep.subr.mxu0 %v2279_v54 }
  0xb6   :  { %v300_v60 = vadd.f32 %v3479_v43, %v261_v56  ;;  %v299_v61 = vadd.f32 %v3479_v43, %v260_v57  ;;  %2619 = vmatmul.mubr.msk.f32.gmra.mxu0 %vm356_vm0, %v2953_v58  ;;  %v2957_v2 = vpop.eup %2956  ;;  %v2277_v56 = vld [vmem:[%s3969_s3 + $0xa8] sm:$0xff]  ;;  %v2276_v57 = vld [vmem:[%s3969_s3 + $0xa0] sm:$0xff] }
  0xb7   :  { %v192_v62 = vpop.permute.xlu1 %191  ;;  %v187_v63 = vpop.permute.xlu0 %186  ;;  %2621 = vmatprep.mubr.msk.f32.mxu0 %vm356_vm0, %v2955_v59  ;;  %2716 = vmatpush3.msra.mxu0 %v2279_v54  ;;  %v3614_v58 = vld [vmem:[%s3970_s4] ss:$0 sm:$0xff] }
  0xb8   :  { %2970 = vtanh.f32 %v300_v60  ;;  %v263_v0 = vmul.f32 %v3474_v42, %v192_v62  ;;  %v262_v1 = vmul.f32 %v3474_v42, %v187_v63  ;;  %2717 = vmatprep.subr.mxu0 %v2278_v55 }
  0xb9   :  { %2972 = vtanh.f32 %v299_v61  ;;  %v2959_v3 = vpop.eup %2958  ;;  %2718 = vmatpush3.msra.mxu0 %v2278_v55 }
  0xba   :  { %v302_v4 = vadd.f32 %v3479_v43, %v263_v0  ;;  %v301_v5 = vadd.f32 %v3479_v43, %v262_v1  ;;  %2622 = vmatmul.mubr.msk.f32.gmra.mxu0 %vm356_vm0, %v2957_v2  ;;  %v2961_v8 = vpop.eup %2960  ;;  %2719 = vmatprep.subr.mxu0 %v2277_v56 }
  0xbb   :  { %v202_v6 = vpop.permute.xlu1 %201  ;;  %v197_v7 = vpop.permute.xlu0 %196  ;;  %2624 = vmatprep.mubr.msk.f32.mxu0 %vm356_vm0, %v2959_v3  ;;  %2720 = vmatpush3.msra.mxu0 %v2277_v56 }
  0xbc   :  { %2974 = vtanh.f32 %v302_v4  ;;  %v265_v9 = vmul.f32 %v3474_v42, %v202_v6  ;;  %v264_v10 = vmul.f32 %v3474_v42, %v197_v7  ;;  %2721 = vmatprep.subr.mxu0 %v2276_v57 }
  0xbd   :  { %v2963_v11 = vpop.eup %2962  ;;  %2976 = vtanh.f32 %v301_v5  ;;  %2722 = vmatpush3.msra.mxu0 %v2276_v57 }
  0xbe   :  { %v2965_v12 = vpop.eup %2964  ;;  %v304_v13 = vadd.f32 %v3479_v43, %v265_v9  ;;  %v303_v14 = vadd.f32 %v3479_v43, %v264_v10  ;;  %2625 = vmatmul.mubr.msk.f32.gmra.mxu0 %vm356_vm0, %v2961_v8 }
  0xbf   :  { %2627 = vmatprep.mubr.msk.f32.mxu1 %vm356_vm0, %v2965_v12  ;;  %v212_v15 = vpop.permute.xlu1 %211  ;;  %v207_v16 = vpop.permute.xlu0 %206 }
  0xc0   :  { %2978 = vtanh.f32 %v304_v13  ;;  %v267_v18 = vmul.f32 %v3474_v42, %v212_v15  ;;  %2628 = vmatmul.mubr.msk.f32.vlgmr.msra.gmra.mxu1 %vm356_vm0, %v2963_v11  ;;  %v266_v19 = vmul.f32 %v3474_v42, %v207_v16 }
  0xc1   :  { %v2967_v20 = vpop.eup %2966  ;;  %2980 = vtanh.f32 %v303_v14  ;;  %2652 = vmatpush3.msra.mxu1 %v3468_v41 }
  0xc2   :  { %v2969_v22 = vpop.eup %2968  ;;  %v306_v23 = vadd.f32 %v3479_v43, %v267_v18  ;;  %v305_v24 = vadd.f32 %v3479_v43, %v266_v19  ;;  %2653 = vmatprep.subr.mxu1 %v2237_v17 }
  0xc3   :  { %2630 = vmatprep.mubr.msk.f32.mxu1 %vm356_vm0, %v2969_v22  ;;  %v222_v25 = vpop.permute.xlu1 %221  ;;  %v217_v26 = vpop.permute.xlu0 %216  ;;  %2654 = vmatpush3.msra.mxu1 %v2237_v17 }
  0xc4   :  { %2982 = vtanh.f32 %v306_v23  ;;  %v269_v41 = vmul.f32 %v3474_v42, %v222_v25  ;;  %2631 = vmatmul.mubr.msk.f32.gmra.mxu1 %vm356_vm0, %v2967_v20  ;;  %v268_v28 = vmul.f32 %v3474_v42, %v217_v26  ;;  %2655 = vmatprep.subr.mxu1 %v2236_v21 }
  0xc5   :  { %v2971_v29 = vpop.eup %2970  ;;  %2984 = vtanh.f32 %v305_v24  ;;  %2656 = vmatpush3.msra.mxu1 %v2236_v21 }
  0xc6   :  { %v2973_v30 = vpop.eup %2972  ;;  %v308_v31 = vadd.f32 %v3479_v43, %v269_v41  ;;  %v307_v32 = vadd.f32 %v3479_v43, %v268_v28  ;;  %2657 = vmatprep.subr.mxu1 %v2235_v27 }
  0xc7   :  { %2633 = vmatprep.mubr.msk.f32.mxu1 %vm356_vm0, %v2973_v30  ;;  %v232_v33 = vpop.permute.xlu1 %231  ;;  %v227_v34 = vpop.permute.xlu0 %226  ;;  %2658 = vmatpush3.msra.mxu1 %v2235_v27 }
  0xc8   :  { %2986 = vtanh.f32 %v308_v31  ;;  %v271_v35 = vmul.f32 %v3474_v42, %v232_v33  ;;  %2634 = vmatmul.mubr.msk.f32.gmra.mxu1 %vm356_vm0, %v2971_v29  ;;  %v270_v36 = vmul.f32 %v3474_v42, %v227_v34  ;;  %2659 = vmatprep.subr.mxu1 %v2234_v50 }
  0xc9   :  { %v2975_v37 = vpop.eup %2974  ;;  %2988 = vtanh.f32 %v307_v32  ;;  %2660 = vmatpush3.msra.mxu1 %v2234_v50 }
  0xca   :  { %v2977_v38 = vpop.eup %2976  ;;  %v310_v39 = vadd.f32 %v3479_v43, %v271_v35  ;;  %v309_v40 = vadd.f32 %v3479_v43, %v270_v36  ;;  %2661 = vmatprep.subr.mxu1 %v2233_v51 }
  0xcb   :  { %2636 = vmatprep.mubr.msk.f32.mxu1 %vm356_vm0, %v2977_v38  ;;  %2662 = vmatpush3.msra.mxu1 %v2233_v51 }
  0xcc   :  { %2990 = vtanh.f32 %v310_v39  ;;  %2637 = vmatmul.mubr.msk.f32.gmra.mxu1 %vm356_vm0, %v2975_v37  ;;  %2663 = vmatprep.subr.mxu1 %v2232_v52 }
  0xcd   :  { %v2979_v44 = vpop.eup %2978  ;;  %2992 = vtanh.f32 %v309_v40  ;;  %2664 = vmatpush3.msra.mxu1 %v2232_v52 }
  0xce   :  { %v2981_v45 = vpop.eup %2980  ;;  %2665 = vmatprep.subr.mxu1 %v2231_v53 }
  0xcf   :  { %2639 = vmatprep.mubr.msk.f32.mxu1 %vm356_vm0, %v2981_v45  ;;  %2666 = vmatpush3.msra.mxu1 %v2231_v53 }
  0xd0   :  { %2640 = vmatmul.mubr.msk.f32.gmra.mxu1 %vm356_vm0, %v2979_v44 }
  0xd1   :  { %v2983_v42 = vpop.eup %2982 }
  0xd2   :  { %v2985_v46 = vpop.eup %2984 }
  0xd3   :  { %2642 = vmatprep.mubr.msk.f32.mxu1 %vm356_vm0, %v2985_v46 }
  0xd4   :  { %2643 = vmatmul.mubr.msk.f32.gmra.mxu1 %vm356_vm0, %v2983_v42 }
  0xd5   :  { %v2987_v47 = vpop.eup %2986 }
  0xd6   :  { %v2989_v43 = vpop.eup %2988 }
  0xd7   :  { %2645 = vmatprep.mubr.msk.f32.mxu1 %vm356_vm0, %v2989_v43 }
  0xd8   :  { %2646 = vmatmul.mubr.msk.f32.gmra.mxu1 %vm356_vm0, %v2987_v47 }
  0xd9   :  { %v2991_v48 = vpop.eup %2990 }
  0xda   :  { %v2993_v49 = vpop.eup %2992 }
  0xdb   :  { %2648 = vmatprep.mubr.msk.f32.mxu1 %vm356_vm0, %v2993_v49 }
  0xdc   :  { %2649 = vmatmul.mubr.msk.f32.gmra.mxu1 %vm356_vm0, %v2991_v48 }
 0x162   :  { %v2605_v59 = vpop.f32.mrf.mxu0 }
 0x163   :  { %v525_v60 = vadd.f32 %v2605_v59, %v3614_v58 }
 0x164   :  { %v519_v61 = vpop.f32.mrf.mxu0 }
 0x165   :  { %v520_v62 = vadd.f32 %v3614_v58, %v519_v61 }
 0x166   :  { %v2608_v63 = vpop.f32.mrf.mxu0 }
 0x167   :  { %2994 = vtanh.f32 %v520_v62  ;;  %v535_v0 = vadd.f32 %v2608_v63, %v3614_v58 }
 0x168   :  { %2996 = vtanh.f32 %v525_v60  ;;  %v529_v1 = vpop.f32.mrf.mxu0 }
 0x169   :  { %v530_v2 = vadd.f32 %v3614_v58, %v529_v1 }
 0x16a   :  { %v2611_v3 = vpop.f32.mrf.mxu0 }
 0x16b   :  { %2998 = vtanh.f32 %v530_v2  ;;  %v545_v4 = vadd.f32 %v2611_v3, %v3614_v58 }
 0x16c   :  { %3000 = vtanh.f32 %v535_v0  ;;  %v539_v5 = vpop.f32.mrf.mxu0 }
 0x16d   :  { %v540_v6 = vadd.f32 %v3614_v58, %v539_v5 }
 0x16e   :  { %v2614_v7 = vpop.f32.mrf.mxu0 }
 0x16f   :  { %3002 = vtanh.f32 %v540_v6  ;;  %v555_v8 = vadd.f32 %v2614_v7, %v3614_v58 }
 0x170   :  { %3004 = vtanh.f32 %v545_v4  ;;  %v549_v9 = vpop.f32.mrf.mxu0 }
 0x171   :  { %v550_v10 = vadd.f32 %v3614_v58, %v549_v9 }
 0x172   :  { %v2617_v11 = vpop.f32.mrf.mxu0 }
 0x173   :  { %3006 = vtanh.f32 %v550_v10  ;;  %v565_v13 = vadd.f32 %v2617_v11, %v3614_v58 }
 0x174   :  { %v2995_v12 = vpop.eup %2994  ;;  %3008 = vtanh.f32 %v555_v8  ;;  %v559_v14 = vpop.f32.mrf.mxu0 }
 0x175   :  { %v2997_v15 = vpop.eup %2996  ;;  %v560_v16 = vadd.f32 %v3614_v58, %v559_v14  ;;  %2667 = vmatprep.mubr.msk.f32.mxu1 %vm356_vm0, %v2995_v12 }
 0x176   :  { %v2620_v17 = vpop.f32.mrf.mxu0  ;;  %2668 = vmatmul.mubr.msk.f32.vlgmr.msra.gmra.mxu1 %vm356_vm0, %v2997_v15 }
 0x177   :  { %3010 = vtanh.f32 %v560_v16  ;;  %v575_v19 = vadd.f32 %v2620_v17, %v3614_v58 }
 0x178   :  { %v2999_v18 = vpop.eup %2998  ;;  %3012 = vtanh.f32 %v565_v13  ;;  %v569_v20 = vpop.f32.mrf.mxu0 }
 0x179   :  { %v3001_v21 = vpop.eup %3000  ;;  %v570_v22 = vadd.f32 %v3614_v58, %v569_v20  ;;  %2670 = vmatprep.mubr.msk.f32.mxu1 %vm356_vm0, %v2999_v18 }
 0x17a   :  { %v2623_v23 = vpop.f32.mrf.mxu0  ;;  %2671 = vmatmul.mubr.msk.f32.gmra.mxu1 %vm356_vm0, %v3001_v21 }
 0x17b   :  { %3014 = vtanh.f32 %v570_v22  ;;  %v585_v25 = vadd.f32 %v2623_v23, %v3614_v58 }
 0x17c   :  { %v3003_v24 = vpop.eup %3002  ;;  %3016 = vtanh.f32 %v575_v19  ;;  %v579_v26 = vpop.f32.mrf.mxu0 }
 0x17d   :  { %v3005_v27 = vpop.eup %3004  ;;  %v580_v41 = vadd.f32 %v3614_v58, %v579_v26  ;;  %2673 = vmatprep.mubr.msk.f32.mxu1 %vm356_vm0, %v3003_v24 }
 0x17e   :  { %v2626_v28 = vpop.f32.mrf.mxu0  ;;  %2674 = vmatmul.mubr.msk.f32.gmra.mxu1 %vm356_vm0, %v3005_v27  ;;  %v2275_v27 = vld [vmem:[%s3969_s3 + $0x98] sm:$0xff] }
 0x17f   :  { %3018 = vtanh.f32 %v580_v41  ;;  %v595_v29 = vadd.f32 %v2626_v28, %v3614_v58  ;;  %2723 = vmatprep.subr.mxu0 %v2275_v27  ;;  %v2274_v41 = vld [vmem:[%s3969_s3 + $0x90] sm:$0xff]  ;;  %v2273_v28 = vld [vmem:[%s3969_s3 + $0x88] sm:$0xff] }
 0x180   :  { %v2629_v30 = vpop.f32.mrf.mxu1  ;;  %v3007_v31 = vpop.eup %3006  ;;  %3020 = vtanh.f32 %v585_v25  ;;  %2724 = vmatpush3.msra.mxu0 %v2275_v27 }
 0x181   :  { %v589_v32 = vpop.f32.mrf.mxu0  ;;  %v3009_v33 = vpop.eup %3008  ;;  %2676 = vmatprep.mubr.msk.f32.mxu1 %vm356_vm0, %v3007_v31  ;;  %3022 = vtanh.f32 %v595_v29  ;;  %v605_v37 = vadd.f32 %v2629_v30, %v3614_v58  ;;  %2725 = vmatprep.subr.mxu0 %v2274_v41  ;;  %v2272_v29 = vld [vmem:[%s3969_s3 + $0x80] sm:$0xff]  ;;  %v2320_v30 = vld [vmem:[%s3969_s3 + $0xf8] sm:$0xff]  ;;  %v2319_v31 = vld [vmem:[%s3969_s3 + $0xf0] sm:$0xff] }
 0x182   :  { %v590_v34 = vadd.f32 %v3614_v58, %v589_v32  ;;  %v599_v35 = vpop.f32.mrf.mxu1  ;;  %2677 = vmatmul.mubr.msk.f32.gmra.mxu1 %vm356_vm0, %v3009_v33  ;;  %2726 = vmatpush3.msra.mxu0 %v2274_v41  ;;  %v2318_v32 = vld [vmem:[%s3969_s3 + $0xe8] sm:$0xff]  ;;  %v2317_v33 = vld [vmem:[%s3969_s3 + $0xe0] sm:$0xff] }
 0x183   :  { %v600_v36 = vadd.f32 %v3614_v58, %v599_v35  ;;  %2727 = vmatprep.subr.mxu0 %v2273_v28  ;;  %2779 = vmatprep.subr.mxu1 %v2320_v30  ;;  %v2315_v35 = vld [vmem:[%s3969_s3 + $0xd0] sm:$0xff] }
 0x184   :  { %3024 = vtanh.f32 %v590_v34  ;;  %v2632_v38 = vpop.f32.mrf.mxu1  ;;  %v3011_v39 = vpop.eup %3010  ;;  %2728 = vmatpush3.msra.mxu0 %v2273_v28  ;;  %2780 = vmatpush3.msra.mxu1 %v2320_v30  ;;  %v2316_v34 = vld [vmem:[%s3969_s3 + $0xd8] sm:$0xff] }
 0x185   :  { %3026 = vtanh.f32 %v600_v36  ;;  %v3013_v40 = vpop.eup %3012  ;;  %2679 = vmatprep.mubr.msk.f32.mxu1 %vm356_vm0, %v3011_v39  ;;  %v615_v42 = vadd.f32 %v2632_v38, %v3614_v58  ;;  %2729 = vmatprep.subr.mxu0 %v2272_v29  ;;  %v3713_v36 = vld [vmem:[%s3970_s4 + $0x1] ss:$0 sm:$0xff] }
 0x186   :  { %v609_v44 = vpop.f32.mrf.mxu1  ;;  %2680 = vmatmul.mubr.msk.f32.gmra.mxu1 %vm356_vm0, %v3013_v40  ;;  %3028 = vtanh.f32 %v605_v37  ;;  %2730 = vmatpush3.msra.mxu0 %v2272_v29 }
 0x187   :  { %v610_v45 = vadd.f32 %v3614_v58, %v609_v44  ;;  %2781 = vmatprep.subr.mxu1 %v2319_v31 }
 0x188   :  { %v2635_v46 = vpop.f32.mrf.mxu1  ;;  %v3015_v47 = vpop.eup %3014  ;;  %2782 = vmatpush3.msra.mxu1 %v2319_v31 }
 0x189   :  { %3030 = vtanh.f32 %v610_v45  ;;  %v3017_v43 = vpop.eup %3016  ;;  %2682 = vmatprep.mubr.msk.f32.mxu1 %vm356_vm0, %v3015_v47  ;;  %v625_v50 = vadd.f32 %v2635_v46, %v3614_v58  ;;  %2783 = vmatprep.subr.mxu1 %v2318_v32 }
 0x18a   :  { %v619_v48 = vpop.f32.mrf.mxu1  ;;  %2683 = vmatmul.mubr.msk.f32.gmra.mxu1 %vm356_vm0, %v3017_v43  ;;  %3032 = vtanh.f32 %v615_v42 }
 0x18b   :  { %v620_v49 = vadd.f32 %v3614_v58, %v619_v48  ;;  %2784 = vmatpush3.msra.mxu1 %v2318_v32 }
 0x18c   :  { %v2638_v51 = vpop.f32.mrf.mxu1  ;;  %v3019_v52 = vpop.eup %3018  ;;  %2785 = vmatprep.subr.mxu1 %v2317_v33 }
 0x18d   :  { %3034 = vtanh.f32 %v620_v49  ;;  %v3021_v53 = vpop.eup %3020  ;;  %2685 = vmatprep.mubr.msk.f32.mxu1 %vm356_vm0, %v3019_v52  ;;  %v635_v57 = vadd.f32 %v2638_v51, %v3614_v58  ;;  %2786 = vmatpush3.msra.mxu1 %v2317_v33 }
 0x18e   :  { %v629_v54 = vpop.f32.mrf.mxu1  ;;  %2686 = vmatmul.mubr.msk.f32.gmra.mxu1 %vm356_vm0, %v3021_v53  ;;  %v3023_v56 = vpop.eup %3022  ;;  %3036 = vtanh.f32 %v625_v50  ;;  %2787 = vmatprep.subr.mxu1 %v2316_v34 }
 0x18f   :  { %v630_v55 = vadd.f32 %v3614_v58, %v629_v54  ;;  %2788 = vmatpush3.msra.mxu1 %v2316_v34 }
 0x190   :  { %v2641_v59 = vpop.f32.mrf.mxu1  ;;  %2789 = vmatprep.subr.mxu1 %v2315_v35 }
 0x191   :  { %v3025_v60 = vpop.eup %3024  ;;  %3038 = vtanh.f32 %v630_v55  ;;  %v645_v0 = vadd.f32 %v2641_v59, %v3614_v58  ;;  %2790 = vmatpush3.msra.mxu1 %v2315_v35 }
 0x192   :  { %v3027_v61 = vpop.eup %3026  ;;  %v639_v62 = vpop.f32.mrf.mxu1  ;;  %2688 = vmatprep.mubr.msk.f32.mxu1 %vm356_vm0, %v3025_v60  ;;  %3040 = vtanh.f32 %v635_v57 }
 0x193   :  { %v640_v63 = vadd.f32 %v3614_v58, %v639_v62  ;;  %2689 = vmatmul.mubr.msk.f32.gmra.mxu1 %vm356_vm0, %v3023_v56  ;;  %v3029_v2 = vpop.eup %3028 }
 0x194   :  { %v2644_v1 = vpop.f32.mrf.mxu1  ;;  %2691 = vmatprep.mubr.msk.f32.mxu1 %vm356_vm0, %v3027_v61 }
 0x195   :  { %3042 = vtanh.f32 %v640_v63  ;;  %v655_v6 = vadd.f32 %v2644_v1, %v3614_v58 }
 0x196   :  { %v3031_v3 = vpop.eup %3030  ;;  %v649_v4 = vpop.f32.mrf.mxu1  ;;  %3044 = vtanh.f32 %v645_v0 }
 0x197   :  { %v650_v5 = vadd.f32 %v3614_v58, %v649_v4  ;;  %2692 = vmatmul.mubr.msk.f32.gmra.mxu1 %vm356_vm0, %v3029_v2  ;;  %v3033_v8 = vpop.eup %3032 }
 0x198   :  { %v2647_v7 = vpop.f32.mrf.mxu1  ;;  %2694 = vmatprep.mubr.msk.f32.mxu1 %vm356_vm0, %v3031_v3 }
 0x199   :  { %3046 = vtanh.f32 %v650_v5  ;;  %v665_v12 = vadd.f32 %v2647_v7, %v3614_v58 }
 0x19a   :  { %v3035_v9 = vpop.eup %3034  ;;  %v659_v10 = vpop.f32.mrf.mxu1  ;;  %3048 = vtanh.f32 %v655_v6 }
 0x19b   :  { %v660_v11 = vadd.f32 %v3614_v58, %v659_v10  ;;  %2695 = vmatmul.mubr.msk.f32.gmra.mxu1 %vm356_vm0, %v3033_v8  ;;  %v3037_v14 = vpop.eup %3036 }
 0x19c   :  { %v2650_v13 = vpop.f32.mrf.mxu1  ;;  %2697 = vmatprep.mubr.msk.f32.mxu1 %vm356_vm0, %v3035_v9 }
 0x19d   :  { %3050 = vtanh.f32 %v660_v11  ;;  %v675_v19 = vadd.f32 %v2650_v13, %v3614_v58 }
 0x19e   :  { %v3039_v15 = vpop.eup %3038  ;;  %v669_v16 = vpop.f32.mrf.mxu1  ;;  %3052 = vtanh.f32 %v665_v12 }
 0x19f   :  { %v670_v17 = vadd.f32 %v3614_v58, %v669_v16  ;;  %2698 = vmatmul.mubr.msk.f32.gmra.mxu1 %vm356_vm0, %v3037_v14  ;;  %v3041_v18 = vpop.eup %3040 }
 0x1a0   :  { %2700 = vmatprep.mubr.msk.f32.mxu1 %vm356_vm0, %v3039_v15 }
 0x1a1   :  { %3054 = vtanh.f32 %v670_v17 }
 0x1a2   :  { %v3043_v20 = vpop.eup %3042  ;;  %3056 = vtanh.f32 %v675_v19 }
 0x1a3   :  { %2701 = vmatmul.mubr.msk.f32.gmra.mxu1 %vm356_vm0, %v3041_v18  ;;  %v3045_v21 = vpop.eup %3044 }
 0x1a4   :  { %2703 = vmatprep.mubr.msk.f32.mxu1 %vm356_vm0, %v3043_v20 }
 0x1a6   :  { %v3047_v22 = vpop.eup %3046 }
 0x1a7   :  { %2704 = vmatmul.mubr.msk.f32.gmra.mxu1 %vm356_vm0, %v3045_v21  ;;  %v3049_v23 = vpop.eup %3048 }
 0x1a8   :  { %2706 = vmatprep.mubr.msk.f32.mxu1 %vm356_vm0, %v3047_v22 }
 0x1aa   :  { %v3051_v24 = vpop.eup %3050 }
 0x1ab   :  { %2707 = vmatmul.mubr.msk.f32.gmra.mxu1 %vm356_vm0, %v3049_v23  ;;  %v3053_v58 = vpop.eup %3052 }
 0x1ac   :  { %2709 = vmatprep.mubr.msk.f32.mxu1 %vm356_vm0, %v3051_v24 }
 0x1ae   :  { %v3055_v25 = vpop.eup %3054 }
 0x1af   :  { %2710 = vmatmul.mubr.msk.f32.gmra.mxu1 %vm356_vm0, %v3053_v58  ;;  %v3057_v26 = vpop.eup %3056 }
 0x1b0   :  { %2712 = vmatprep.mubr.msk.f32.mxu1 %vm356_vm0, %v3055_v25 }
 0x1b3   :  { %2713 = vmatmul.mubr.msk.f32.gmra.mxu1 %vm356_vm0, %v3057_v26 }
 0x236   :  { %v2669_v37 = vpop.f32.mrf.mxu1 }
 0x237   :  { %v892_v38 = vadd.f32 %v2669_v37, %v3713_v36 }
 0x238   :  { %v886_v39 = vpop.f32.mrf.mxu1 }
 0x239   :  { %v887_v40 = vadd.f32 %v3713_v36, %v886_v39 }
 0x23a   :  { %v2672_v44 = vpop.f32.mrf.mxu1 }
 0x23b   :  { %3058 = vtanh.f32 %v887_v40  ;;  %v902_v45 = vadd.f32 %v2672_v44, %v3713_v36 }
 0x23c   :  { %3060 = vtanh.f32 %v892_v38  ;;  %v896_v42 = vpop.f32.mrf.mxu1 }
 0x23d   :  { %v897_v46 = vadd.f32 %v3713_v36, %v896_v42 }
 0x23e   :  { %v2675_v47 = vpop.f32.mrf.mxu1 }
 0x23f   :  { %3062 = vtanh.f32 %v897_v46  ;;  %v912_v43 = vadd.f32 %v2675_v47, %v3713_v36 }
 0x240   :  { %3064 = vtanh.f32 %v902_v45  ;;  %v906_v48 = vpop.f32.mrf.mxu1 }
 0x241   :  { %v907_v49 = vadd.f32 %v3713_v36, %v906_v48 }
 0x242   :  { %v2678_v50 = vpop.f32.mrf.mxu1 }
 0x243   :  { %3066 = vtanh.f32 %v907_v49  ;;  %v922_v51 = vadd.f32 %v2678_v50, %v3713_v36 }
 0x244   :  { %3068 = vtanh.f32 %v912_v43  ;;  %v916_v52 = vpop.f32.mrf.mxu1 }
 0x245   :  { %v917_v53 = vadd.f32 %v3713_v36, %v916_v52 }
 0x246   :  { %v2681_v54 = vpop.f32.mrf.mxu1 }
 0x247   :  { %3070 = vtanh.f32 %v917_v53  ;;  %v932_v56 = vadd.f32 %v2681_v54, %v3713_v36 }
 0x248   :  { %v3059_v55 = vpop.eup %3058  ;;  %3072 = vtanh.f32 %v922_v51  ;;  %v926_v57 = vpop.f32.mrf.mxu1 }
 0x249   :  { %v3061_v59 = vpop.eup %3060  ;;  %v927_v60 = vadd.f32 %v3713_v36, %v926_v57  ;;  %2731 = vmatprep.mubr.msk.f32.mxu0 %vm356_vm0, %v3059_v55 }
 0x24a   :  { %v2684_v61 = vpop.f32.mrf.mxu1  ;;  %2732 = vmatmul.mubr.msk.f32.vlgmr.msra.gmra.mxu0 %vm356_vm0, %v3061_v59 }
 0x24b   :  { %3074 = vtanh.f32 %v927_v60  ;;  %v942_v63 = vadd.f32 %v2684_v61, %v3713_v36 }
 0x24c   :  { %v3063_v62 = vpop.eup %3062  ;;  %3076 = vtanh.f32 %v932_v56  ;;  %v936_v0 = vpop.f32.mrf.mxu1 }
 0x24d   :  { %v3065_v1 = vpop.eup %3064  ;;  %v937_v2 = vadd.f32 %v3713_v36, %v936_v0  ;;  %2734 = vmatprep.mubr.msk.f32.mxu0 %vm356_vm0, %v3063_v62 }
 0x24e   :  { %v2687_v3 = vpop.f32.mrf.mxu1  ;;  %2735 = vmatmul.mubr.msk.f32.gmra.mxu0 %vm356_vm0, %v3065_v1 }
 0x24f   :  { %3078 = vtanh.f32 %v937_v2  ;;  %v952_v5 = vadd.f32 %v2687_v3, %v3713_v36 }
 0x250   :  { %v3067_v4 = vpop.eup %3066  ;;  %3080 = vtanh.f32 %v942_v63  ;;  %v946_v6 = vpop.f32.mrf.mxu1 }
 0x251   :  { %v3069_v7 = vpop.eup %3068  ;;  %v947_v8 = vadd.f32 %v3713_v36, %v946_v6  ;;  %2737 = vmatprep.mubr.msk.f32.mxu0 %vm356_vm0, %v3067_v4 }
 0x252   :  { %2738 = vmatmul.mubr.msk.f32.gmra.mxu0 %vm356_vm0, %v3069_v7  ;;  %v2314_v7 = vld [vmem:[%s3969_s3 + $0xc8] sm:$0xff] }
 0x253   :  { %v2690_v9 = vpop.f32.mrf.mxu1  ;;  %3082 = vtanh.f32 %v947_v8  ;;  %2791 = vmatprep.subr.mxu1 %v2314_v7  ;;  %v2313_v8 = vld [vmem:[%s3969_s3 + $0xc0] sm:$0xff] }
 0x254   :  { %v3071_v10 = vpop.eup %3070  ;;  %3084 = vtanh.f32 %v952_v5  ;;  %v962_v11 = vadd.f32 %v2690_v9, %v3713_v36  ;;  %2792 = vmatpush3.msra.mxu1 %v2314_v7  ;;  %v1818_v9 = vld [vmem:[#allocation2 + $0x38] sm:$0xff] }
 0x255   :  { %v956_v12 = vpop.f32.mrf.mxu1  ;;  %v3073_v13 = vpop.eup %3072  ;;  %2740 = vmatprep.mubr.msk.f32.mxu0 %vm356_vm0, %v3071_v10  ;;  %2793 = vmatprep.subr.mxu1 %v2313_v8  ;;  %v1817_v10 = vld [vmem:[#allocation2 + $0x30] sm:$0xff] }
 0x256   :  { %v957_v14 = vadd.f32 %v3713_v36, %v956_v12  ;;  %2741 = vmatmul.mubr.msk.f32.gmra.mxu0 %vm356_vm0, %v3073_v13  ;;  %2794 = vmatpush3.msra.mxu1 %v2313_v8  ;;  %v1815_v12 = vld [vmem:[#allocation2 + $0x20] sm:$0xff]  ;;  %v1814_v13 = vld [vmem:[#allocation2 + $0x18] sm:$0xff] }
 0x257   :  { %v2693_v15 = vpop.f32.mrf.mxu1  ;;  %2843 = vmatprep.subr.mxu0 %v1818_v9 }
 0x258   :  { %3086 = vtanh.f32 %v957_v14  ;;  %v3075_v16 = vpop.eup %3074  ;;  %v972_v17 = vadd.f32 %v2693_v15, %v3713_v36  ;;  %2844 = vmatpush3.msra.mxu0 %v1818_v9  ;;  %v1813_v14 = vld [vmem:[#allocation2 + $0x10] sm:$0xff]  ;;  %v3788_v15 = vld [vmem:[%s3970_s4 + $0x2] ss:$0 sm:$0xff] }
 0x259   :  { %3088 = vtanh.f32 %v962_v11  ;;  %v966_v18 = vpop.f32.mrf.mxu1  ;;  %v3077_v19 = vpop.eup %3076  ;;  %2743 = vmatprep.mubr.msk.f32.mxu0 %vm356_vm0, %v3075_v16  ;;  %v1816_v11 = vld [vmem:[#allocation2 + $0x28] sm:$0xff]  ;;  %2845 = vmatprep.subr.mxu0 %v1817_v10 }
 0x25a   :  { %v967_v20 = vadd.f32 %v3713_v36, %v966_v18  ;;  %2744 = vmatmul.mubr.msk.f32.gmra.mxu0 %vm356_vm0, %v3077_v19 }
 0x25b   :  { %v2696_v21 = vpop.f32.mrf.mxu1  ;;  %2846 = vmatpush3.msra.mxu0 %v1817_v10 }
 0x25c   :  { %3090 = vtanh.f32 %v967_v20  ;;  %v3079_v22 = vpop.eup %3078  ;;  %v982_v23 = vadd.f32 %v2696_v21, %v3713_v36  ;;  %2847 = vmatprep.subr.mxu0 %v1816_v11 }
 0x25d   :  { %3092 = vtanh.f32 %v972_v17  ;;  %v976_v24 = vpop.f32.mrf.mxu1  ;;  %v3081_v58 = vpop.eup %3080  ;;  %2746 = vmatprep.mubr.msk.f32.mxu0 %vm356_vm0, %v3079_v22  ;;  %2848 = vmatpush3.msra.mxu0 %v1816_v11 }
 0x25e   :  { %v977_v25 = vadd.f32 %v3713_v36, %v976_v24  ;;  %2747 = vmatmul.mubr.msk.f32.gmra.mxu0 %vm356_vm0, %v3081_v58  ;;  %2849 = vmatprep.subr.mxu0 %v1815_v12 }
 0x25f   :  { %v2699_v26 = vpop.f32.mrf.mxu1  ;;  %2850 = vmatpush3.msra.mxu0 %v1815_v12 }
 0x260   :  { %3094 = vtanh.f32 %v977_v25  ;;  %v3083_v27 = vpop.eup %3082  ;;  %v992_v41 = vadd.f32 %v2699_v26, %v3713_v36  ;;  %2851 = vmatprep.subr.mxu0 %v1814_v13 }
 0x261   :  { %3096 = vtanh.f32 %v982_v23  ;;  %v986_v28 = vpop.f32.mrf.mxu1  ;;  %v3085_v29 = vpop.eup %3084  ;;  %2749 = vmatprep.mubr.msk.f32.mxu0 %vm356_vm0, %v3083_v27  ;;  %2852 = vmatpush3.msra.mxu0 %v1814_v13 }
 0x262   :  { %v987_v30 = vadd.f32 %v3713_v36, %v986_v28  ;;  %2750 = vmatmul.mubr.msk.f32.gmra.mxu0 %vm356_vm0, %v3085_v29  ;;  %2853 = vmatprep.subr.mxu0 %v1813_v14 }
 0x263   :  { %v2702_v31 = vpop.f32.mrf.mxu1  ;;  %2854 = vmatpush3.msra.mxu0 %v1813_v14 }
 0x264   :  { %3098 = vtanh.f32 %v987_v30  ;;  %v1002_v33 = vadd.f32 %v2702_v31, %v3713_v36 }
 0x265   :  { %v3087_v32 = vpop.eup %3086  ;;  %3100 = vtanh.f32 %v992_v41  ;;  %v996_v34 = vpop.f32.mrf.mxu1 }
 0x266   :  { %v3089_v35 = vpop.eup %3088  ;;  %v997_v37 = vadd.f32 %v3713_v36, %v996_v34  ;;  %2752 = vmatprep.mubr.msk.f32.mxu0 %vm356_vm0, %v3087_v32 }
 0x267   :  { %v2705_v38 = vpop.f32.mrf.mxu1  ;;  %2753 = vmatmul.mubr.msk.f32.gmra.mxu0 %vm356_vm0, %v3089_v35 }
 0x268   :  { %3102 = vtanh.f32 %v997_v37  ;;  %v1012_v40 = vadd.f32 %v2705_v38, %v3713_v36 }
 0x269   :  { %v3091_v39 = vpop.eup %3090  ;;  %3104 = vtanh.f32 %v1002_v33  ;;  %v1006_v44 = vpop.f32.mrf.mxu1 }
 0x26a   :  { %v3093_v45 = vpop.eup %3092  ;;  %v1007_v42 = vadd.f32 %v3713_v36, %v1006_v44  ;;  %2755 = vmatprep.mubr.msk.f32.mxu0 %vm356_vm0, %v3091_v39 }
 0x26b   :  { %v2708_v46 = vpop.f32.mrf.mxu1  ;;  %2756 = vmatmul.mubr.msk.f32.gmra.mxu0 %vm356_vm0, %v3093_v45 }
 0x26c   :  { %3106 = vtanh.f32 %v1007_v42  ;;  %v1022_v43 = vadd.f32 %v2708_v46, %v3713_v36 }
 0x26d   :  { %v3095_v47 = vpop.eup %3094  ;;  %3108 = vtanh.f32 %v1012_v40  ;;  %v1016_v48 = vpop.f32.mrf.mxu1 }
 0x26e   :  { %v3097_v49 = vpop.eup %3096  ;;  %v1017_v50 = vadd.f32 %v3713_v36, %v1016_v48  ;;  %2758 = vmatprep.mubr.msk.f32.mxu0 %vm356_vm0, %v3095_v47 }
 0x26f   :  { %v2711_v51 = vpop.f32.mrf.mxu1  ;;  %2759 = vmatmul.mubr.msk.f32.gmra.mxu0 %vm356_vm0, %v3097_v49 }
 0x270   :  { %3110 = vtanh.f32 %v1017_v50  ;;  %v1032_v53 = vadd.f32 %v2711_v51, %v3713_v36 }
 0x271   :  { %v3099_v52 = vpop.eup %3098  ;;  %3112 = vtanh.f32 %v1022_v43  ;;  %v1026_v54 = vpop.f32.mrf.mxu1 }
 0x272   :  { %v3101_v55 = vpop.eup %3100  ;;  %v1027_v56 = vadd.f32 %v3713_v36, %v1026_v54  ;;  %2761 = vmatprep.mubr.msk.f32.mxu0 %vm356_vm0, %v3099_v52 }
 0x273   :  { %v2714_v57 = vpop.f32.mrf.mxu1  ;;  %2762 = vmatmul.mubr.msk.f32.gmra.mxu0 %vm356_vm0, %v3101_v55 }
 0x274   :  { %3114 = vtanh.f32 %v1027_v56  ;;  %v1042_v60 = vadd.f32 %v2714_v57, %v3713_v36 }
 0x275   :  { %v3103_v59 = vpop.eup %3102  ;;  %3116 = vtanh.f32 %v1032_v53  ;;  %v1036_v61 = vpop.f32.mrf.mxu1 }
 0x276   :  { %v3105_v62 = vpop.eup %3104  ;;  %v1037_v63 = vadd.f32 %v3713_v36, %v1036_v61  ;;  %2764 = vmatprep.mubr.msk.f32.mxu0 %vm356_vm0, %v3103_v59 }
 0x277   :  { %2765 = vmatmul.mubr.msk.f32.gmra.mxu0 %vm356_vm0, %v3105_v62 }
 0x278   :  { %3118 = vtanh.f32 %v1037_v63 }
 0x279   :  { %v3107_v0 = vpop.eup %3106  ;;  %3120 = vtanh.f32 %v1042_v60 }
 0x27a   :  { %v3109_v1 = vpop.eup %3108  ;;  %2767 = vmatprep.mubr.msk.f32.mxu0 %vm356_vm0, %v3107_v0 }
 0x27b   :  { %2768 = vmatmul.mubr.msk.f32.gmra.mxu0 %vm356_vm0, %v3109_v1 }
 0x27d   :  { %v3111_v2 = vpop.eup %3110 }
 0x27e   :  { %v3113_v3 = vpop.eup %3112  ;;  %2770 = vmatprep.mubr.msk.f32.mxu0 %vm356_vm0, %v3111_v2 }
 0x27f   :  { %2771 = vmatmul.mubr.msk.f32.gmra.mxu0 %vm356_vm0, %v3113_v3 }
 0x281   :  { %v3115_v4 = vpop.eup %3114 }
 0x282   :  { %v3117_v36 = vpop.eup %3116  ;;  %2773 = vmatprep.mubr.msk.f32.mxu0 %vm356_vm0, %v3115_v4 }
 0x283   :  { %2774 = vmatmul.mubr.msk.f32.gmra.mxu0 %vm356_vm0, %v3117_v36 }
 0x285   :  { %v3119_v5 = vpop.eup %3118 }
 0x286   :  { %v3121_v6 = vpop.eup %3120  ;;  %2776 = vmatprep.mubr.msk.f32.mxu0 %vm356_vm0, %v3119_v5 }
 0x287   :  { %2777 = vmatmul.mubr.msk.f32.gmra.mxu0 %vm356_vm0, %v3121_v6 }
 0x30a   :  { %v2733_v16 = vpop.f32.mrf.mxu0 }
 0x30b   :  { %v1259_v17 = vadd.f32 %v2733_v16, %v3788_v15 }
 0x30c   :  { %v1253_v18 = vpop.f32.mrf.mxu0 }
 0x30d   :  { %v1254_v19 = vadd.f32 %v3788_v15, %v1253_v18 }
 0x30e   :  { %v2736_v20 = vpop.f32.mrf.mxu0 }
 0x30f   :  { %3122 = vtanh.f32 %v1254_v19  ;;  %v1269_v21 = vadd.f32 %v2736_v20, %v3788_v15 }
 0x310   :  { %3124 = vtanh.f32 %v1259_v17  ;;  %v1263_v22 = vpop.f32.mrf.mxu0 }
 0x311   :  { %v1264_v23 = vadd.f32 %v3788_v15, %v1263_v22 }
 0x312   :  { %v2739_v24 = vpop.f32.mrf.mxu0 }
 0x313   :  { %3126 = vtanh.f32 %v1264_v23  ;;  %v1279_v58 = vadd.f32 %v2739_v24, %v3788_v15 }
 0x314   :  { %3128 = vtanh.f32 %v1269_v21  ;;  %v1273_v25 = vpop.f32.mrf.mxu0 }
 0x315   :  { %v1274_v26 = vadd.f32 %v3788_v15, %v1273_v25 }
 0x316   :  { %v2742_v27 = vpop.f32.mrf.mxu0 }
 0x317   :  { %3130 = vtanh.f32 %v1274_v26  ;;  %v1289_v41 = vadd.f32 %v2742_v27, %v3788_v15 }
 0x318   :  { %3132 = vtanh.f32 %v1279_v58  ;;  %v1283_v28 = vpop.f32.mrf.mxu0 }
 0x319   :  { %v1284_v29 = vadd.f32 %v3788_v15, %v1283_v28 }
 0x31a   :  { %v2745_v30 = vpop.f32.mrf.mxu0 }
 0x31b   :  { %3134 = vtanh.f32 %v1284_v29  ;;  %v1299_v32 = vadd.f32 %v2745_v30, %v3788_v15 }
 0x31c   :  { %v3123_v31 = vpop.eup %3122  ;;  %3136 = vtanh.f32 %v1289_v41  ;;  %v1293_v33 = vpop.f32.mrf.mxu0 }
 0x31d   :  { %v3125_v34 = vpop.eup %3124  ;;  %v1294_v35 = vadd.f32 %v3788_v15, %v1293_v33  ;;  %2795 = vmatprep.mubr.msk.f32.mxu1 %vm356_vm0, %v3123_v31 }
 0x31e   :  { %v2748_v37 = vpop.f32.mrf.mxu0  ;;  %2796 = vmatmul.mubr.msk.f32.vlgmr.msra.gmra.mxu1 %vm356_vm0, %v3125_v34 }
 0x31f   :  { %3138 = vtanh.f32 %v1294_v35  ;;  %v1309_v39 = vadd.f32 %v2748_v37, %v3788_v15 }
 0x320   :  { %v3127_v38 = vpop.eup %3126  ;;  %3140 = vtanh.f32 %v1299_v32  ;;  %v1303_v40 = vpop.f32.mrf.mxu0 }
 0x321   :  { %v3129_v44 = vpop.eup %3128  ;;  %v1304_v45 = vadd.f32 %v3788_v15, %v1303_v40  ;;  %2798 = vmatprep.mubr.msk.f32.mxu1 %vm356_vm0, %v3127_v38 }
 0x322   :  { %v2751_v42 = vpop.f32.mrf.mxu0  ;;  %2799 = vmatmul.mubr.msk.f32.gmra.mxu1 %vm356_vm0, %v3129_v44 }
 0x323   :  { %3142 = vtanh.f32 %v1304_v45  ;;  %v1319_v47 = vadd.f32 %v2751_v42, %v3788_v15 }
 0x324   :  { %v3131_v46 = vpop.eup %3130  ;;  %3144 = vtanh.f32 %v1309_v39  ;;  %v1313_v43 = vpop.f32.mrf.mxu0 }
 0x325   :  { %v3133_v48 = vpop.eup %3132  ;;  %v1314_v49 = vadd.f32 %v3788_v15, %v1313_v43  ;;  %2801 = vmatprep.mubr.msk.f32.mxu1 %vm356_vm0, %v3131_v46 }
 0x326   :  { %2802 = vmatmul.mubr.msk.f32.gmra.mxu1 %vm356_vm0, %v3133_v48  ;;  %v1812_v48 = vld [vmem:[#allocation2 + $0x8] sm:$0xff] }
 0x327   :  { %v2754_v50 = vpop.f32.mrf.mxu0  ;;  %3146 = vtanh.f32 %v1314_v49  ;;  %2855 = vmatprep.subr.mxu0 %v1812_v48  ;;  %v1811_v49 = vld [vmem:[#allocation2] sm:$0xff] }
 0x328   :  { %v3135_v51 = vpop.eup %3134  ;;  %3148 = vtanh.f32 %v1319_v47  ;;  %v1329_v52 = vadd.f32 %v2754_v50, %v3788_v15  ;;  %2856 = vmatpush3.msra.mxu0 %v1812_v48  ;;  %v3857_v50 = vld [vmem:[%s3970_s4 + $0x3] ss:$0 sm:$0xff] }
 0x329   :  { %v1323_v53 = vpop.f32.mrf.mxu0  ;;  %v3137_v54 = vpop.eup %3136  ;;  %2804 = vmatprep.mubr.msk.f32.mxu1 %vm356_vm0, %v3135_v51  ;;  %2857 = vmatprep.subr.mxu0 %v1811_v49 }
 0x32a   :  { %v1324_v55 = vadd.f32 %v3788_v15, %v1323_v53  ;;  %2805 = vmatmul.mubr.msk.f32.gmra.mxu1 %vm356_vm0, %v3137_v54  ;;  %2858 = vmatpush3.msra.mxu0 %v1811_v49 }
 0x32b   :  { %v2757_v56 = vpop.f32.mrf.mxu0 }
 0x32c   :  { %3150 = vtanh.f32 %v1324_v55  ;;  %v3139_v57 = vpop.eup %3138  ;;  %v1339_v59 = vadd.f32 %v2757_v56, %v3788_v15 }
 0x32d   :  { %3152 = vtanh.f32 %v1329_v52  ;;  %v1333_v60 = vpop.f32.mrf.mxu0  ;;  %v3141_v61 = vpop.eup %3140  ;;  %2807 = vmatprep.mubr.msk.f32.mxu1 %vm356_vm0, %v3139_v57 }
 0x32e   :  { %v1334_v62 = vadd.f32 %v3788_v15, %v1333_v60  ;;  %2808 = vmatmul.mubr.msk.f32.gmra.mxu1 %vm356_vm0, %v3141_v61 }
 0x32f   :  { %v2760_v63 = vpop.f32.mrf.mxu0 }
 0x330   :  { %3154 = vtanh.f32 %v1334_v62  ;;  %v3143_v0 = vpop.eup %3142  ;;  %v1349_v1 = vadd.f32 %v2760_v63, %v3788_v15 }
 0x331   :  { %3156 = vtanh.f32 %v1339_v59  ;;  %v1343_v2 = vpop.f32.mrf.mxu0  ;;  %v3145_v3 = vpop.eup %3144  ;;  %2810 = vmatprep.mubr.msk.f32.mxu1 %vm356_vm0, %v3143_v0 }
 0x332   :  { %v1344_v4 = vadd.f32 %v3788_v15, %v1343_v2  ;;  %2811 = vmatmul.mubr.msk.f32.gmra.mxu1 %vm356_vm0, %v3145_v3 }
 0x333   :  { %v2763_v36 = vpop.f32.mrf.mxu0 }
 0x334   :  { %3158 = vtanh.f32 %v1344_v4  ;;  %v3147_v5 = vpop.eup %3146  ;;  %v1359_v6 = vadd.f32 %v2763_v36, %v3788_v15 }
 0x335   :  { %3160 = vtanh.f32 %v1349_v1  ;;  %v1353_v7 = vpop.f32.mrf.mxu0  ;;  %v3149_v8 = vpop.eup %3148  ;;  %2813 = vmatprep.mubr.msk.f32.mxu1 %vm356_vm0, %v3147_v5 }
 0x336   :  { %v1354_v9 = vadd.f32 %v3788_v15, %v1353_v7  ;;  %2814 = vmatmul.mubr.msk.f32.gmra.mxu1 %vm356_vm0, %v3149_v8 }
 0x337   :  { %v2766_v10 = vpop.f32.mrf.mxu0 }
 0x338   :  { %3162 = vtanh.f32 %v1354_v9  ;;  %v1369_v12 = vadd.f32 %v2766_v10, %v3788_v15 }
 0x339   :  { %v3151_v11 = vpop.eup %3150  ;;  %3164 = vtanh.f32 %v1359_v6  ;;  %v1363_v13 = vpop.f32.mrf.mxu0 }
 0x33a   :  { %v3153_v14 = vpop.eup %3152  ;;  %v1364_v16 = vadd.f32 %v3788_v15, %v1363_v13  ;;  %2816 = vmatprep.mubr.msk.f32.mxu1 %vm356_vm0, %v3151_v11 }
 0x33b   :  { %v2769_v17 = vpop.f32.mrf.mxu0  ;;  %2817 = vmatmul.mubr.msk.f32.gmra.mxu1 %vm356_vm0, %v3153_v14 }
 0x33c   :  { %3166 = vtanh.f32 %v1364_v16  ;;  %v1379_v19 = vadd.f32 %v2769_v17, %v3788_v15 }
 0x33d   :  { %v3155_v18 = vpop.eup %3154  ;;  %3168 = vtanh.f32 %v1369_v12  ;;  %v1373_v20 = vpop.f32.mrf.mxu0 }
 0x33e   :  { %v3157_v21 = vpop.eup %3156  ;;  %v1374_v22 = vadd.f32 %v3788_v15, %v1373_v20  ;;  %2819 = vmatprep.mubr.msk.f32.mxu1 %vm356_vm0, %v3155_v18 }
 0x33f   :  { %v2772_v23 = vpop.f32.mrf.mxu0  ;;  %2820 = vmatmul.mubr.msk.f32.gmra.mxu1 %vm356_vm0, %v3157_v21 }
 0x340   :  { %3170 = vtanh.f32 %v1374_v22  ;;  %v1389_v58 = vadd.f32 %v2772_v23, %v3788_v15 }
 0x341   :  { %v3159_v24 = vpop.eup %3158  ;;  %3172 = vtanh.f32 %v1379_v19  ;;  %v1383_v25 = vpop.f32.mrf.mxu0 }
 0x342   :  { %v3161_v26 = vpop.eup %3160  ;;  %v1384_v27 = vadd.f32 %v3788_v15, %v1383_v25  ;;  %2822 = vmatprep.mubr.msk.f32.mxu1 %vm356_vm0, %v3159_v24 }
 0x343   :  { %v2775_v41 = vpop.f32.mrf.mxu0  ;;  %2823 = vmatmul.mubr.msk.f32.gmra.mxu1 %vm356_vm0, %v3161_v26 }
 0x344   :  { %3174 = vtanh.f32 %v1384_v27  ;;  %v1399_v29 = vadd.f32 %v2775_v41, %v3788_v15 }
 0x345   :  { %v3163_v28 = vpop.eup %3162  ;;  %3176 = vtanh.f32 %v1389_v58  ;;  %v1393_v30 = vpop.f32.mrf.mxu0 }
 0x346   :  { %v3165_v31 = vpop.eup %3164  ;;  %v1394_v32 = vadd.f32 %v3788_v15, %v1393_v30  ;;  %2825 = vmatprep.mubr.msk.f32.mxu1 %vm356_vm0, %v3163_v28 }
 0x347   :  { %v2778_v33 = vpop.f32.mrf.mxu0  ;;  %2826 = vmatmul.mubr.msk.f32.gmra.mxu1 %vm356_vm0, %v3165_v31 }
 0x348   :  { %3178 = vtanh.f32 %v1394_v32  ;;  %v1409_v35 = vadd.f32 %v2778_v33, %v3788_v15 }
 0x349   :  { %v3167_v34 = vpop.eup %3166  ;;  %3180 = vtanh.f32 %v1399_v29  ;;  %v1403_v37 = vpop.f32.mrf.mxu0 }
 0x34a   :  { %v3169_v38 = vpop.eup %3168  ;;  %v1404_v39 = vadd.f32 %v3788_v15, %v1403_v37  ;;  %2828 = vmatprep.mubr.msk.f32.mxu1 %vm356_vm0, %v3167_v34 }
 0x34b   :  { %2829 = vmatmul.mubr.msk.f32.gmra.mxu1 %vm356_vm0, %v3169_v38 }
 0x34c   :  { %3182 = vtanh.f32 %v1404_v39 }
 0x34d   :  { %v3171_v40 = vpop.eup %3170  ;;  %3184 = vtanh.f32 %v1409_v35 }
 0x34e   :  { %v3173_v44 = vpop.eup %3172  ;;  %2831 = vmatprep.mubr.msk.f32.mxu1 %vm356_vm0, %v3171_v40 }
 0x34f   :  { %2832 = vmatmul.mubr.msk.f32.gmra.mxu1 %vm356_vm0, %v3173_v44 }
 0x351   :  { %v3175_v45 = vpop.eup %3174 }
 0x352   :  { %v3177_v42 = vpop.eup %3176  ;;  %2834 = vmatprep.mubr.msk.f32.mxu1 %vm356_vm0, %v3175_v45 }
 0x353   :  { %2835 = vmatmul.mubr.msk.f32.gmra.mxu1 %vm356_vm0, %v3177_v42 }
 0x355   :  { %v3179_v46 = vpop.eup %3178 }
 0x356   :  { %v3181_v15 = vpop.eup %3180  ;;  %2837 = vmatprep.mubr.msk.f32.mxu1 %vm356_vm0, %v3179_v46 }
 0x357   :  { %2838 = vmatmul.mubr.msk.f32.gmra.mxu1 %vm356_vm0, %v3181_v15 }
 0x359   :  { %v3183_v47 = vpop.eup %3182 }
 0x35a   :  { %v3185_v43 = vpop.eup %3184  ;;  %2840 = vmatprep.mubr.msk.f32.mxu1 %vm356_vm0, %v3183_v47 }
 0x35b   :  { %2841 = vmatmul.mubr.msk.f32.gmra.mxu1 %vm356_vm0, %v3185_v43 }
 0x3de   :  { %v2797_v51 = vpop.f32.mrf.mxu1 }
 0x3df   :  { %v1626_v52 = vadd.f32 %v2797_v51, %v3857_v50 }
 0x3e0   :  { %v1620_v53 = vpop.f32.mrf.mxu1 }
 0x3e1   :  { %v1621_v54 = vadd.f32 %v3857_v50, %v1620_v53 }
 0x3e2   :  { %v2800_v55 = vpop.f32.mrf.mxu1 }
 0x3e3   :  { %3186 = vtanh.f32 %v1621_v54  ;;  %v1636_v56 = vadd.f32 %v2800_v55, %v3857_v50 }
 0x3e4   :  { %3188 = vtanh.f32 %v1626_v52  ;;  %v1630_v57 = vpop.f32.mrf.mxu1 }
 0x3e5   :  { %v1631_v59 = vadd.f32 %v3857_v50, %v1630_v57 }
 0x3e6   :  { %v2803_v60 = vpop.f32.mrf.mxu1 }
 0x3e7   :  { %3190 = vtanh.f32 %v1631_v59  ;;  %v1646_v61 = vadd.f32 %v2803_v60, %v3857_v50 }
 0x3e8   :  { %3192 = vtanh.f32 %v1636_v56  ;;  %v1640_v62 = vpop.f32.mrf.mxu1 }
 0x3e9   :  { %v1641_v63 = vadd.f32 %v3857_v50, %v1640_v62 }
 0x3ea   :  { %v2806_v0 = vpop.f32.mrf.mxu1 }
 0x3eb   :  { %3194 = vtanh.f32 %v1641_v63  ;;  %v1656_v1 = vadd.f32 %v2806_v0, %v3857_v50 }
 0x3ec   :  { %3196 = vtanh.f32 %v1646_v61  ;;  %v1650_v2 = vpop.f32.mrf.mxu1 }
 0x3ed   :  { %v1651_v3 = vadd.f32 %v3857_v50, %v1650_v2 }
 0x3ee   :  { %v2809_v4 = vpop.f32.mrf.mxu1 }
 0x3ef   :  { %3198 = vtanh.f32 %v1651_v3  ;;  %v1666_v5 = vadd.f32 %v2809_v4, %v3857_v50 }
 0x3f0   :  { %v3187_v36 = vpop.eup %3186  ;;  %3200 = vtanh.f32 %v1656_v1  ;;  %v1660_v6 = vpop.f32.mrf.mxu1 }
 0x3f1   :  { %v3189_v7 = vpop.eup %3188  ;;  %v1661_v8 = vadd.f32 %v3857_v50, %v1660_v6  ;;  %2859 = vmatprep.mubr.msk.f32.mxu0 %vm356_vm0, %v3187_v36 }
 0x3f2   :  { %v2812_v9 = vpop.f32.mrf.mxu1  ;;  %2860 = vmatmul.mubr.msk.f32.vlgmr.msra.gmra.mxu0 %vm356_vm0, %v3189_v7 }
 0x3f3   :  { %3202 = vtanh.f32 %v1661_v8  ;;  %v1676_v11 = vadd.f32 %v2812_v9, %v3857_v50 }
 0x3f4   :  { %v3191_v10 = vpop.eup %3190  ;;  %3204 = vtanh.f32 %v1666_v5  ;;  %v1670_v12 = vpop.f32.mrf.mxu1 }
 0x3f5   :  { %v3193_v13 = vpop.eup %3192  ;;  %v1671_v14 = vadd.f32 %v3857_v50, %v1670_v12  ;;  %2862 = vmatprep.mubr.msk.f32.mxu0 %vm356_vm0, %v3191_v10 }
 0x3f6   :  { %v2815_v16 = vpop.f32.mrf.mxu1  ;;  %2863 = vmatmul.mubr.msk.f32.gmra.mxu0 %vm356_vm0, %v3193_v13 }
 0x3f7   :  { %3206 = vtanh.f32 %v1671_v14  ;;  %v1686_v18 = vadd.f32 %v2815_v16, %v3857_v50 }
 0x3f8   :  { %v3195_v17 = vpop.eup %3194  ;;  %3208 = vtanh.f32 %v1676_v11  ;;  %v1680_v19 = vpop.f32.mrf.mxu1 }
 0x3f9   :  { %v3197_v20 = vpop.eup %3196  ;;  %v1681_v21 = vadd.f32 %v3857_v50, %v1680_v19  ;;  %2865 = vmatprep.mubr.msk.f32.mxu0 %vm356_vm0, %v3195_v17 }
 0x3fa   :  { %2866 = vmatmul.mubr.msk.f32.gmra.mxu0 %vm356_vm0, %v3197_v20  ;;  %v3926_v20 = vld [vmem:[%s3972_s6] ss:$0 sm:$0xff]  ;;  %s3298_s6 = smov [#allocation5]  }
 0x3fb   :  { %v2818_v22 = vpop.f32.mrf.mxu1  ;;  %3210 = vtanh.f32 %v1681_v21  ;;  %s2184_s30 = sshll.u32 %s3298_s6, 4  ;;  %s2185_s30 = int_to_ptr.vmem [resolvable:$true] %s2184_s30 }
 0x3fc   :  { %v3199_v23 = vpop.eup %3198  ;;  %3212 = vtanh.f32 %v1686_v18  ;;  %v1696_v24 = vadd.f32 %v2818_v22, %v3857_v50  ;;  %s3270_s8 = scalar_lea.vmem %s2185_s30, 4096  ;;  %p3275_p6 = scmp.lt.s32.totalorder %s2185_s30, %s2185_s30 }
 0x3fd   :  { %v1690_v58 = vpop.f32.mrf.mxu1  ;;  %v3201_v25 = vpop.eup %3200  ;;  %2868 = vmatprep.mubr.msk.f32.mxu0 %vm356_vm0, %v3199_v23  ;;  %p3271_p5 = scmp.ne.s32.totalorder %s2185_s30, %s3270_s8  ;;  %p3276_p7 = scmp.lt.s32.totalorder %s3270_s8, %s3270_s8 }
 0x3fe   :  { %v1691_v26 = vadd.f32 %v3857_v50, %v1690_v58  ;;  %2869 = vmatmul.mubr.msk.f32.gmra.mxu0 %vm356_vm0, %v3201_v25 }
 0x3ff   :  { %v2821_v27 = vpop.f32.mrf.mxu1  ;;  %p3277_p8 = por %p3276_p7, %p3275_p6 }
 0x400   :  { %3214 = vtanh.f32 %v1691_v26  ;;  %v3203_v41 = vpop.eup %3202  ;;  %v1706_v28 = vadd.f32 %v2821_v27, %v3857_v50 }
 0x401   :  { %3216 = vtanh.f32 %v1696_v24  ;;  %v1700_v29 = vpop.f32.mrf.mxu1  ;;  %v3205_v30 = vpop.eup %3204  ;;  %2871 = vmatprep.mubr.msk.f32.mxu0 %vm356_vm0, %v3203_v41  ;;  %p3278_p9 = pnand %p3277_p8, %p3271_p5 }
 0x402   :  { %v1701_v31 = vadd.f32 %v3857_v50, %v1700_v29  ;;  %2872 = vmatmul.mubr.msk.f32.gmra.mxu0 %vm356_vm0, %v3205_v30 }
 0x403   :  { %v2824_v32 = vpop.f32.mrf.mxu1 }
 0x404   :  { %3218 = vtanh.f32 %v1701_v31  ;;  %v3207_v33 = vpop.eup %3206  ;;  %v1716_v34 = vadd.f32 %v2824_v32, %v3857_v50 }
 0x405   :  { %3220 = vtanh.f32 %v1706_v28  ;;  %v1710_v35 = vpop.f32.mrf.mxu1  ;;  %v3209_v37 = vpop.eup %3208  ;;  %2874 = vmatprep.mubr.msk.f32.mxu0 %vm356_vm0, %v3207_v33 }
 0x406   :  { %v1711_v38 = vadd.f32 %v3857_v50, %v1710_v35  ;;  %2875 = vmatmul.mubr.msk.f32.gmra.mxu0 %vm356_vm0, %v3209_v37 }
 0x407   :  { %v2827_v39 = vpop.f32.mrf.mxu1 }
 0x408   :  { %3222 = vtanh.f32 %v1711_v38  ;;  %v3211_v40 = vpop.eup %3210  ;;  %v1726_v44 = vadd.f32 %v2827_v39, %v3857_v50 }
 0x409   :  { %3224 = vtanh.f32 %v1716_v34  ;;  %v1720_v45 = vpop.f32.mrf.mxu1  ;;  %v3213_v42 = vpop.eup %3212  ;;  %2877 = vmatprep.mubr.msk.f32.mxu0 %vm356_vm0, %v3211_v40 }
 0x40a   :  { %v1721_v46 = vadd.f32 %v3857_v50, %v1720_v45  ;;  %2878 = vmatmul.mubr.msk.f32.gmra.mxu0 %vm356_vm0, %v3213_v42 }
 0x40b   :  { %v2830_v15 = vpop.f32.mrf.mxu1 }
 0x40c   :  { %3226 = vtanh.f32 %v1721_v46  ;;  %v1736_v43 = vadd.f32 %v2830_v15, %v3857_v50 }
 0x40d   :  { %v3215_v47 = vpop.eup %3214  ;;  %3228 = vtanh.f32 %v1726_v44  ;;  %v1730_v48 = vpop.f32.mrf.mxu1 }
 0x40e   :  { %v3217_v49 = vpop.eup %3216  ;;  %v1731_v51 = vadd.f32 %v3857_v50, %v1730_v48  ;;  %2880 = vmatprep.mubr.msk.f32.mxu0 %vm356_vm0, %v3215_v47 }
 0x40f   :  { %v2833_v52 = vpop.f32.mrf.mxu1  ;;  %2881 = vmatmul.mubr.msk.f32.gmra.mxu0 %vm356_vm0, %v3217_v49 }
 0x410   :  { %3230 = vtanh.f32 %v1731_v51  ;;  %v1746_v54 = vadd.f32 %v2833_v52, %v3857_v50 }
 0x411   :  { %v3219_v53 = vpop.eup %3218  ;;  %3232 = vtanh.f32 %v1736_v43  ;;  %v1740_v55 = vpop.f32.mrf.mxu1 }
 0x412   :  { %v3221_v56 = vpop.eup %3220  ;;  %v1741_v57 = vadd.f32 %v3857_v50, %v1740_v55  ;;  %2883 = vmatprep.mubr.msk.f32.mxu0 %vm356_vm0, %v3219_v53 }
 0x413   :  { %v2836_v59 = vpop.f32.mrf.mxu1  ;;  %2884 = vmatmul.mubr.msk.f32.gmra.mxu0 %vm356_vm0, %v3221_v56 }
 0x414   :  { %3234 = vtanh.f32 %v1741_v57  ;;  %v1756_v61 = vadd.f32 %v2836_v59, %v3857_v50 }
 0x415   :  { %v3223_v60 = vpop.eup %3222  ;;  %3236 = vtanh.f32 %v1746_v54  ;;  %v1750_v62 = vpop.f32.mrf.mxu1 }
 0x416   :  { %v3225_v63 = vpop.eup %3224  ;;  %v1751_v0 = vadd.f32 %v3857_v50, %v1750_v62  ;;  %2886 = vmatprep.mubr.msk.f32.mxu0 %vm356_vm0, %v3223_v60 }
 0x417   :  { %v2839_v1 = vpop.f32.mrf.mxu1  ;;  %2887 = vmatmul.mubr.msk.f32.gmra.mxu0 %vm356_vm0, %v3225_v63 }
 0x418   :  { %3238 = vtanh.f32 %v1751_v0  ;;  %v1766_v3 = vadd.f32 %v2839_v1, %v3857_v50 }
 0x419   :  { %v3227_v2 = vpop.eup %3226  ;;  %3240 = vtanh.f32 %v1756_v61  ;;  %v1760_v4 = vpop.f32.mrf.mxu1 }
 0x41a   :  { %v3229_v36 = vpop.eup %3228  ;;  %v1761_v5 = vadd.f32 %v3857_v50, %v1760_v4  ;;  %2889 = vmatprep.mubr.msk.f32.mxu0 %vm356_vm0, %v3227_v2 }
 0x41b   :  { %v2842_v6 = vpop.f32.mrf.mxu1  ;;  %2890 = vmatmul.mubr.msk.f32.gmra.mxu0 %vm356_vm0, %v3229_v36 }
 0x41c   :  { %3242 = vtanh.f32 %v1761_v5  ;;  %v1776_v8 = vadd.f32 %v2842_v6, %v3857_v50 }
 0x41d   :  { %v3231_v7 = vpop.eup %3230  ;;  %3244 = vtanh.f32 %v1766_v3  ;;  %v1770_v9 = vpop.f32.mrf.mxu1 }
 0x41e   :  { %v3233_v10 = vpop.eup %3232  ;;  %v1771_v11 = vadd.f32 %v3857_v50, %v1770_v9  ;;  %2892 = vmatprep.mubr.msk.f32.mxu0 %vm356_vm0, %v3231_v7 }
 0x41f   :  { %2893 = vmatmul.mubr.msk.f32.gmra.mxu0 %vm356_vm0, %v3233_v10 }
 0x420   :  { %3246 = vtanh.f32 %v1771_v11 }
 0x421   :  { %v3235_v12 = vpop.eup %3234  ;;  %3248 = vtanh.f32 %v1776_v8 }
 0x422   :  { %v3237_v13 = vpop.eup %3236  ;;  %2895 = vmatprep.mubr.msk.f32.mxu0 %vm356_vm0, %v3235_v12 }
 0x423   :  { %2896 = vmatmul.mubr.msk.f32.gmra.mxu0 %vm356_vm0, %v3237_v13 }
 0x425   :  { %v3239_v14 = vpop.eup %3238 }
 0x426   :  { %v3241_v16 = vpop.eup %3240  ;;  %2898 = vmatprep.mubr.msk.f32.mxu0 %vm356_vm0, %v3239_v14 }
 0x427   :  { %2899 = vmatmul.mubr.msk.f32.gmra.mxu0 %vm356_vm0, %v3241_v16 }
 0x429   :  { %v3243_v17 = vpop.eup %3242 }
 0x42a   :  { %v3245_v50 = vpop.eup %3244  ;;  %2901 = vmatprep.mubr.msk.f32.mxu0 %vm356_vm0, %v3243_v17 }
 0x42b   :  { %2902 = vmatmul.mubr.msk.f32.gmra.mxu0 %vm356_vm0, %v3245_v50 }
 0x42d   :  { %v3247_v18 = vpop.eup %3246 }
 0x42e   :  { %v3249_v19 = vpop.eup %3248  ;;  %2904 = vmatprep.mubr.msk.f32.mxu0 %vm356_vm0, %v3247_v18 }
 0x42f   :  { %2905 = vmatmul.mubr.msk.f32.gmra.mxu0 %vm356_vm0, %v3249_v19 }
 0x4b2   :  { %v2861_v21 = vpop.f32.mrf.mxu0 }
 0x4b3   :  { %v1994_v22 = vadd.f32 %v2861_v21, %v3926_v20 }
 0x4b4   :  { %v1988_v23 = vpop.f32.mrf.mxu0 }
 0x4b5   :  { %2148 = vst [vmem:[#allocation5 + $0x8] sm:$0xff] %v1994_v22  ;;  %v1989_v24 = vadd.f32 %v3926_v20, %v1988_v23 }
 0x4b6   :  { %v2864_v58 = vpop.f32.mrf.mxu0 }
 0x4b7   :  { %2147 = vst [vmem:[#allocation5] sm:$0xff] %v1989_v24  ;;  %v2004_v25 = vadd.f32 %v2864_v58, %v3926_v20 }
 0x4b8   :  { %v1998_v26 = vpop.f32.mrf.mxu0 }
 0x4b9   :  { %2150 = vst [vmem:[#allocation5 + $0x18] sm:$0xff] %v2004_v25  ;;  %v1999_v27 = vadd.f32 %v3926_v20, %v1998_v26 }
 0x4ba   :  { %v2867_v41 = vpop.f32.mrf.mxu0 }
 0x4bb   :  { %2149 = vst [vmem:[#allocation5 + $0x10] sm:$0xff] %v1999_v27  ;;  %v2014_v28 = vadd.f32 %v2867_v41, %v3926_v20 }
 0x4bc   :  { %v2008_v29 = vpop.f32.mrf.mxu0 }
 0x4bd   :  { %2152 = vst [vmem:[#allocation5 + $0x28] sm:$0xff] %v2014_v28  ;;  %v2009_v30 = vadd.f32 %v3926_v20, %v2008_v29 }
 0x4be   :  { %v2870_v31 = vpop.f32.mrf.mxu0 }
 0x4bf   :  { %2151 = vst [vmem:[#allocation5 + $0x20] sm:$0xff] %v2009_v30  ;;  %v2024_v32 = vadd.f32 %v2870_v31, %v3926_v20 }
 0x4c0   :  { %v2018_v33 = vpop.f32.mrf.mxu0 }
 0x4c1   :  { %2154 = vst [vmem:[#allocation5 + $0x38] sm:$0xff] %v2024_v32  ;;  %v2019_v34 = vadd.f32 %v3926_v20, %v2018_v33 }
 0x4c2   :  { %v2873_v35 = vpop.f32.mrf.mxu0 }
 0x4c3   :  { %2153 = vst [vmem:[#allocation5 + $0x30] sm:$0xff] %v2019_v34  ;;  %v2034_v37 = vadd.f32 %v2873_v35, %v3926_v20 }
 0x4c4   :  { %v2028_v38 = vpop.f32.mrf.mxu0 }
 0x4c5   :  { %2156 = vst [vmem:[#allocation5 + $0x48] sm:$0xff] %v2034_v37  ;;  %v2029_v39 = vadd.f32 %v3926_v20, %v2028_v38 }
 0x4c6   :  { %v2876_v40 = vpop.f32.mrf.mxu0 }
 0x4c7   :  { %2155 = vst [vmem:[#allocation5 + $0x40] sm:$0xff] %v2029_v39  ;;  %v2044_v44 = vadd.f32 %v2876_v40, %v3926_v20 }
 0x4c8   :  { %v2038_v45 = vpop.f32.mrf.mxu0 }
 0x4c9   :  { %2158 = vst [vmem:[#allocation5 + $0x58] sm:$0xff] %v2044_v44  ;;  %v2039_v42 = vadd.f32 %v3926_v20, %v2038_v45 }
 0x4ca   :  { %v2879_v46 = vpop.f32.mrf.mxu0 }
 0x4cb   :  { %2157 = vst [vmem:[#allocation5 + $0x50] sm:$0xff] %v2039_v42  ;;  %v2054_v15 = vadd.f32 %v2879_v46, %v3926_v20 }
 0x4cc   :  { %v2048_v47 = vpop.f32.mrf.mxu0 }
 0x4cd   :  { %2160 = vst [vmem:[#allocation5 + $0x68] sm:$0xff] %v2054_v15  ;;  %v2049_v43 = vadd.f32 %v3926_v20, %v2048_v47 }
 0x4cf   :  { %v2882_v48 = vpop.f32.mrf.mxu0  ;;  %2159 = vst [vmem:[#allocation5 + $0x60] sm:$0xff] %v2049_v43 }
 0x4d0   :  { %v2064_v49 = vadd.f32 %v2882_v48, %v3926_v20 }
 0x4d1   :  { %v2058_v51 = vpop.f32.mrf.mxu0 }
 0x4d2   :  { %2162 = vst [vmem:[#allocation5 + $0x78] sm:$0xff] %v2064_v49  ;;  %v2059_v52 = vadd.f32 %v3926_v20, %v2058_v51 }
 0x4d3   :  { %v2885_v53 = vpop.f32.mrf.mxu0 }
 0x4d4   :  { %2161 = vst [vmem:[#allocation5 + $0x70] sm:$0xff] %v2059_v52  ;;  %v2074_v54 = vadd.f32 %v2885_v53, %v3926_v20 }
 0x4d5   :  { %v2068_v55 = vpop.f32.mrf.mxu0 }
 0x4d6   :  { %2164 = vst [vmem:[#allocation5 + $0x88] sm:$0xff] %v2074_v54  ;;  %v2069_v56 = vadd.f32 %v3926_v20, %v2068_v55 }
 0x4d7   :  { %v2888_v57 = vpop.f32.mrf.mxu0 }
 0x4d8   :  { %2163 = vst [vmem:[#allocation5 + $0x80] sm:$0xff] %v2069_v56  ;;  %v2084_v59 = vadd.f32 %v2888_v57, %v3926_v20 }
 0x4d9   :  { %v2078_v60 = vpop.f32.mrf.mxu0 }
 0x4da   :  { %2166 = vst [vmem:[#allocation5 + $0x98] sm:$0xff] %v2084_v59  ;;  %v2079_v61 = vadd.f32 %v3926_v20, %v2078_v60 }
 0x4db   :  { %v2891_v62 = vpop.f32.mrf.mxu0 }
 0x4dc   :  { %2165 = vst [vmem:[#allocation5 + $0x90] sm:$0xff] %v2079_v61  ;;  %v2094_v63 = vadd.f32 %v2891_v62, %v3926_v20 }
 0x4dd   :  { %v2088_v0 = vpop.f32.mrf.mxu0 }
 0x4de   :  { %2168 = vst [vmem:[#allocation5 + $0xa8] sm:$0xff] %v2094_v63  ;;  %v2089_v1 = vadd.f32 %v3926_v20, %v2088_v0 }
 0x4df   :  { %v2894_v2 = vpop.f32.mrf.mxu0 }
 0x4e0   :  { %2167 = vst [vmem:[#allocation5 + $0xa0] sm:$0xff] %v2089_v1  ;;  %v2104_v3 = vadd.f32 %v2894_v2, %v3926_v20 }
 0x4e1   :  { %v2098_v4 = vpop.f32.mrf.mxu0 }
 0x4e2   :  { %2170 = vst [vmem:[#allocation5 + $0xb8] sm:$0xff] %v2104_v3  ;;  %v2099_v36 = vadd.f32 %v3926_v20, %v2098_v4 }
 0x4e3   :  { %v2897_v5 = vpop.f32.mrf.mxu0 }
 0x4e4   :  { %2169 = vst [vmem:[#allocation5 + $0xb0] sm:$0xff] %v2099_v36  ;;  %v2114_v6 = vadd.f32 %v2897_v5, %v3926_v20 }
 0x4e5   :  { %v2108_v7 = vpop.f32.mrf.mxu0 }
 0x4e6   :  { %2172 = vst [vmem:[#allocation5 + $0xc8] sm:$0xff] %v2114_v6  ;;  %v2109_v8 = vadd.f32 %v3926_v20, %v2108_v7 }
 0x4e7   :  { %v2900_v9 = vpop.f32.mrf.mxu0 }
 0x4e8   :  { %2171 = vst [vmem:[#allocation5 + $0xc0] sm:$0xff] %v2109_v8  ;;  %v2124_v10 = vadd.f32 %v2900_v9, %v3926_v20 }
 0x4e9   :  { %v2118_v11 = vpop.f32.mrf.mxu0 }
 0x4ea   :  { %2174 = vst [vmem:[#allocation5 + $0xd8] sm:$0xff] %v2124_v10  ;;  %v2119_v12 = vadd.f32 %v3926_v20, %v2118_v11 }
 0x4eb   :  { %v2903_v13 = vpop.f32.mrf.mxu0 }
 0x4ec   :  { %2173 = vst [vmem:[#allocation5 + $0xd0] sm:$0xff] %v2119_v12  ;;  %v2134_v14 = vadd.f32 %v2903_v13, %v3926_v20 }
 0x4ed   :  { %v2128_v16 = vpop.f32.mrf.mxu0 }
 0x4ee   :  { %2176 = vst [vmem:[#allocation5 + $0xe8] sm:$0xff] %v2134_v14  ;;  %v2129_v17 = vadd.f32 %v3926_v20, %v2128_v16 }
 0x4ef   :  { %v2906_v50 = vpop.f32.mrf.mxu0 }
 0x4f0   :  { %2175 = vst [vmem:[#allocation5 + $0xe0] sm:$0xff] %v2129_v17  ;;  %v2144_v18 = vadd.f32 %v2906_v50, %v3926_v20 }
 0x4f1   :  { %v2138_v19 = vpop.f32.mrf.mxu0 }
 0x4f2   :  { %2178 = vst [vmem:[#allocation5 + $0xf8] sm:$0xff] %v2144_v18  ;;  %v2139_v21 = vadd.f32 %v3926_v20, %v2138_v19 }
 0x4f4   :  { %2177 = vst [vmem:[#allocation5 + $0xf0] sm:$0xff] %v2139_v21 }
 0x4f5   :  { %3281 = shalt.err (!%p3278_p9)
}
 0x4f6   :  { %2190 = dma.vmem_to_hbm [thread:$0]  %s2185_s30, 4096, %s3973_s7, [#allocation4], %s3295_s27, %s3295_s27, %s3296_s28  }
 0x4f7   :  { %3292 = dma.done.wait [#allocation4], 4096  }
 0x4f8   :  { %3293 = vsyncadd [#allocation4], 4294963200 }
 0x4f9   :  { %2194 = vsyncpa [#allocation3], 1 }
 0x4fa   :  { %2195 = vsyncpa [#allocation4], 1 }

</bundles_post_ra>
